<compile_context>
chip_gen: v6e
topology: v6e:2x2x1
jax: 0.10.0
libtpu: 0.0.40
codegen_flags: <defaults>
</compile_context>

<pallas_src>
import jax
import jax.numpy as jnp
import numpy as np
from jax import lax
from jax.experimental import pallas as pl
from jax.experimental.pallas import tpu as pltpu

_LANE = 128
_MIB = 1024 * 1024


def _round_up(x, m):
    return (x + m - 1) // m * m


def _vmem_cap_bytes():
    try:
        cap = getattr(pltpu.get_tpu_info(), "vmem_capacity_bytes", None)
        if cap:
            return int(cap)
    except Exception:
        pass
    return 64 * _MIB  # conservative default (v7x per-TC VMEM)


def _vmem_limit(est_bytes):
    """Shape-derived scoped-VMEM request: est + headroom, capped below physical."""
    cap = _vmem_cap_bytes()
    want = max(int(est_bytes * 1.25) + 4 * _MIB, 32 * _MIB)
    return int(min(want, int(cap * 0.8)))


def _pick_c_tile(c):
    """Channel tile: a multiple-of-128 divisor of c (lane-dense transposed
    output blocks) no larger than a generation-aware target, else full c."""
    target = 512 if _vmem_cap_bytes() >= 96 * _MIB else 256
    if c <= target:
        return c
    for tc in range(target, 127, -128):
        if c % tc == 0:
            return tc
    return c


# -----------------------------------------------------------------------------
# Optional single-buffering of grid-constant operands (pipeline_mode=Buffered(1))
# -----------------------------------------------------------------------------
_BUFFERED1_OK = None


def _buffered1_supported():
    global _BUFFERED1_OK
    if _BUFFERED1_OK is None:
        try:
            def _k(x_ref, o_ref):
                o_ref[...] = x_ref[...] + 1.0

            fn = pl.pallas_call(
                _k,
                out_shape=jax.ShapeDtypeStruct((8, 128), jnp.float32),
                grid=(2,),
                in_specs=[pl.BlockSpec((8, 128), lambda i: (0, 0),
                                       pipeline_mode=pl.Buffered(1))],
                out_specs=pl.BlockSpec((8, 128), lambda i: (0, 0)))
            jax.block_until_ready(fn(jnp.zeros((8, 128), jnp.float32)))
            _BUFFERED1_OK = True
        except Exception:
            _BUFFERED1_OK = False
    return _BUFFERED1_OK


def _const_spec(block_shape, index_map):
    """BlockSpec for (mostly) grid-constant operands: single-buffered if the
    installed Pallas supports pipeline_mode, else default double-buffered."""
    if _buffered1_supported():
        return pl.BlockSpec(block_shape, index_map, pipeline_mode=pl.Buffered(1))
    return pl.BlockSpec(block_shape, index_map)


# -----------------------------------------------------------------------------
# TABlock kernel 1: k / v^T projections (channel-tiled).
#   k[c, n]  = sum_m x[c, m] Wk^T[m, n] + bk[n]         -> stored (C, Np)  bf16
#   vT[n, c] = sum_m Wv[n, m] x[c, m]  + bv[n]          -> stored (Np, C) bf16
# -----------------------------------------------------------------------------
def _kv_proj_kernel(x_ref, wk_ref, bk_ref, wv_ref, bvc_ref, k_ref, vt_ref):
    xt = x_ref[0]                                                     # (TC, Np) bf16
    k = jnp.dot(xt, wk_ref[...], preferred_element_type=jnp.float32) + bk_ref[...]
    k_ref[0] = k.astype(jnp.bfloat16)
    # v^T tile via flash-pattern contraction (no in-kernel transpose; Wv stays
    # in PyTorch (out, in) layout).
    vt = lax.dot_general(wv_ref[...], xt, (((1,), (1,)), ((), ())),
                         preferred_element_type=jnp.float32) + bvc_ref[...]
    vt_ref[0] = vt.astype(jnp.bfloat16)


# -----------------------------------------------------------------------------
# TABlock kernel 2: q projection + channel attention (channel-tiled).
# The softmax scale is pre-folded into Wq/bq; the output is emitted transposed
# (Np, TC) so the wrapper's transpose(1,2).reshape is a pure reshape.
# -----------------------------------------------------------------------------
def _tab_attn_kernel(x_ref, wq_ref, bq_ref, k_ref, vt_ref, y_ref):
    xt = x_ref[0]                                                     # (TC, Np) bf16
    q = jnp.dot(xt, wq_ref[...], preferred_element_type=jnp.float32) + bq_ref[...]
    # attn = (q * N^-0.5) @ k^T : contract the token axis of both operands.
    attn = lax.dot_general(q.astype(jnp.bfloat16), k_ref[0],
                           (((1,), (1,)), ((), ())),
                           preferred_element_type=jnp.float32)        # (TC, C) f32
    attn = attn - jnp.max(attn, axis=-1, keepdims=True)
    e = jnp.exp(attn)
    p = e * pl.reciprocal(jnp.sum(e, axis=-1, keepdims=True), approx=True)
    # y^T tile = v^T contracted with p over channels -> (Np, TC), stored bf16.
    yt = lax.dot_general(vt_ref[0], p.astype(jnp.bfloat16),
                         (((1,), (1,)), ((), ())),
                         preferred_element_type=jnp.float32)
    y_ref[0] = yt.astype(jnp.bfloat16)


def tablock(x, wq, bq, wk, bk, wv, bv):
    """x: (B, C, N).  wq/wk/wv: (N, N) PyTorch Linear (out, in) layout."""
    B, C, N = x.shape
    Np = _round_up(N, _LANE)
    TC = _pick_c_tile(C)
    nct = C // TC
    pad = Np - N
    nf = float(N) ** (-0.5)
    cb = 1 if _buffered1_supported() else 2   # buffers for grid-constant operands

    xb = jnp.pad(x, ((0, 0), (0, 0), (0, pad))).astype(jnp.bfloat16)

    def padw_t(w, scale=1.0):    # torch (out,in) -> x @ W layout (in,out), padded
        return jnp.pad(w.T * scale, ((0, pad), (0, pad))).astype(jnp.bfloat16)

    def padw(w):                 # keep torch (out,in) layout, padded
        return jnp.pad(w, ((0, pad), (0, pad))).astype(jnp.bfloat16)

    def padb_row(b, scale=1.0):
        return jnp.pad(b * scale, (0, pad)).reshape(1, Np).astype(jnp.float32)

    def padb_col(b):
        return jnp.pad(b, (0, pad)).reshape(Np, 1).astype(jnp.float32)

    x_spec = pl.BlockSpec((1, TC, Np), lambda b, c: (b, c, 0))

    # ---- kernel 1: k / v^T projections -------------------------------------
    kv_est = (2 * TC * Np * 2
              + cb * (2 * Np * Np * 2 + 2 * Np * 4)
              + 2 * (TC * Np * 2 + Np * TC * 2)
              + 2 * TC * Np * 4)
    k_full, vt_full = pl.pallas_call(
        _kv_proj_kernel,
        out_shape=(jax.ShapeDtypeStruct((B, C, Np), jnp.bfloat16),
                   jax.ShapeDtypeStruct((B, Np, C), jnp.bfloat16)),
        grid=(B, nct),
        in_specs=[
            x_spec,
            _const_spec((Np, Np), lambda b, c: (0, 0)),
            _const_spec((1, Np), lambda b, c: (0, 0)),
            _const_spec((Np, Np), lambda b, c: (0, 0)),
            _const_spec((Np, 1), lambda b, c: (0, 0)),
        ],
        out_specs=(pl.BlockSpec((1, TC, Np), lambda b, c: (b, c, 0)),
                   pl.BlockSpec((1, Np, TC), lambda b, c: (b, 0, c))),
        compiler_params=pltpu.CompilerParams(
            dimension_semantics=("parallel", "parallel"),
            vmem_limit_bytes=_vmem_limit(kv_est)),
    )(xb, padw_t(wk), padb_row(bk), padw(wv), padb_col(bv))

    # ---- kernel 2: q projection + attention ---------------------------------
    attn_est = (2 * TC * Np * 2
                + cb * (Np * Np * 2 + Np * 4 + 2 * C * Np * 2)
                + 2 * Np * TC * 2
                + TC * Np * 4 + TC * C * 4 + TC * C * 2 + Np * TC * 4)
    yt = pl.pallas_call(
        _tab_attn_kernel,
        out_shape=jax.ShapeDtypeStruct((B, Np, C), jnp.bfloat16),
        grid=(B, nct),
        in_specs=[
            x_spec,
            _const_spec((Np, Np), lambda b, c: (0, 0)),
            _const_spec((1, Np), lambda b, c: (0, 0)),
            _const_spec((1, C, Np), lambda b, c: (b, 0, 0)),
            _const_spec((1, Np, C), lambda b, c: (b, 0, 0)),
        ],
        out_specs=pl.BlockSpec((1, Np, TC), lambda b, c: (b, 0, c)),
        compiler_params=pltpu.CompilerParams(
            dimension_semantics=("parallel", "parallel"),
            vmem_limit_bytes=_vmem_limit(attn_est)),
    )(xb, padw_t(wq, nf), padb_row(bq, nf), k_full, vt_full)

    # PyTorch: (attn @ v).transpose(1, 2).reshape(B, C, N).  The kernel already
    # emitted the transposed layout, so this is a slice + pure reshape.
    z = yt[:, :N, :].reshape(B, C, N)
    # proj_drop: identity in eval mode; residual add in f32.
    return z.astype(jnp.float32) + x


# -----------------------------------------------------------------------------
# 1x1 Conv2d == per-batch channel matmul: out[b] = W @ x[b] + bias  (Cout-tiled)
# -----------------------------------------------------------------------------
def _conv1x1_kernel(x_ref, w_ref, b_ref, o_ref):
    o_ref[0] = (jnp.dot(w_ref[...], x_ref[0], preferred_element_type=jnp.float32)
                + b_ref[...]).astype(o_ref.dtype)


def conv1x1(x, w, b):
    B, Cin, N = x.shape
    Cout = w.shape[0]
    Np = _round_up(N, _LANE)
    pad = Np - N
    TCo = _pick_c_tile(Cout)
    nco = Cout // TCo
    xb = jnp.pad(x, ((0, 0), (0, 0), (0, pad))).astype(jnp.bfloat16)

    est = (2 * Cin * Np * 2 + 2 * TCo * Cin * 2 + TCo * 4
           + 2 * TCo * Np * 2 + TCo * Np * 4)
    out = pl.pallas_call(
        _conv1x1_kernel,
        out_shape=jax.ShapeDtypeStruct((B, Cout, Np), jnp.bfloat16),
        grid=(B, nco),
        in_specs=[
            pl.BlockSpec((1, Cin, Np), lambda i, j: (i, 0, 0)),
            pl.BlockSpec((TCo, Cin), lambda i, j: (j, 0)),
            pl.BlockSpec((TCo, 1), lambda i, j: (j, 0)),
        ],
        out_specs=pl.BlockSpec((1, TCo, Np), lambda i, j: (i, j, 0)),
        compiler_params=pltpu.CompilerParams(
            dimension_semantics=("parallel", "parallel"),
            vmem_limit_bytes=_vmem_limit(est)),
    )(xb, w.astype(jnp.bfloat16), b.reshape(Cout, 1).astype(jnp.float32))
    return out[:, :, :N]


# -----------------------------------------------------------------------------
# fc_score / fc_weight heads fused into two matmuls + weighted-mean reduction.
#   f = ReLU(L2s(ReLU(L1s(x)))),  w = sigmoid(L2w(ReLU(L1w(x))))
#   score_b = sum(f * w) / sum(w)            (exact division for the output)
# -----------------------------------------------------------------------------
def _head_kernel(x_ref, w1_ref, b1_ref, w2_ref, b2_ref, o_ref):
    x = x_ref[0]                                                      # (N, Dp) bf16
    h = jnp.maximum(
        jnp.dot(x, w1_ref[...], preferred_element_type=jnp.float32) + b1_ref[...],
        0.0)                                                          # (N, 2Dp)
    z = (jnp.dot(h.astype(jnp.bfloat16), w2_ref[...],
                 preferred_element_type=jnp.float32) + b2_ref[...])   # (N, 2)
    f = jnp.maximum(z[:, 0:1], 0.0)                                   # score branch
    wgt = jax.nn.sigmoid(z[:, 1:2])                                   # weight branch
    num = jnp.sum(f * wgt, keepdims=True)                             # (1, 1)
    den = jnp.sum(wgt, keepdims=True)                                 # (1, 1)
    o_ref[0] = num / den                                              # exact divide


def head(x, w1s, b1s, w2s, b2s, w1w, b1w, w2w, b2w):
    """x: (B, N, D); linear weights in PyTorch (out, in) layout."""
    B, N, D = x.shape
    Dp = _round_up(D, _LANE)
    pad = Dp - D
    cb = 1 if _buffered1_supported() else 2
    xb = jnp.pad(x, ((0, 0), (0, 0), (0, pad))).astype(jnp.bfloat16)

    def p1(w):    # (D, D) torch -> (Dp, Dp) x @ W layout
        return jnp.pad(w.T, ((0, pad), (0, pad)))

    def p2(w):    # (1, D) torch -> (Dp, 1)
        return jnp.pad(w.T, ((0, pad), (0, 0)))

    # Fused score|weight branches.
    w1c = jnp.concatenate([p1(w1s), p1(w1w)], axis=1).astype(jnp.bfloat16)   # (Dp, 2Dp)
    b1c = jnp.concatenate([jnp.pad(b1s, (0, pad)), jnp.pad(b1w, (0, pad))]
                          ).reshape(1, 2 * Dp).astype(jnp.float32)
    zcol = jnp.zeros((Dp, 1), jnp.float32)
    w2c = jnp.concatenate(
        [jnp.concatenate([p2(w2s), zcol], axis=1),
         jnp.concatenate([zcol, p2(w2w)], axis=1)], axis=0).astype(jnp.bfloat16)  # (2Dp, 2)
    b2c = jnp.stack([b2s.reshape(()), b2w.reshape(())]
                    ).reshape(1, 2).astype(jnp.float32)

    est = (2 * N * Dp * 2
           + cb * (Dp * 2 * Dp * 2 + 2 * Dp * 4 + 2 * Dp * 2 * 2 + 8)
           + N * 2 * Dp * 4 + N * 2 * Dp * 2 + 4096)
    out = pl.pallas_call(
        _head_kernel,
        out_shape=jax.ShapeDtypeStruct((B, 1, 1), jnp.float32),
        grid=(B,),
        in_specs=[
            pl.BlockSpec((1, N, Dp), lambda b: (b, 0, 0)),
            _const_spec((Dp, 2 * Dp), lambda b: (0, 0)),
            _const_spec((1, 2 * Dp), lambda b: (0, 0)),
            _const_spec((2 * Dp, 2), lambda b: (0, 0)),
            _const_spec((1, 2), lambda b: (0, 0)),
        ],
        out_specs=pl.BlockSpec((1, 1, 1), lambda b: (b, 0, 0)),
        compiler_params=pltpu.CompilerParams(
            dimension_semantics=("parallel",),
            vmem_limit_bytes=_vmem_limit(est)),
    )(xb, w1c, b1c, w2c, b2c)
    return out[:, 0, 0]


# -----------------------------------------------------------------------------
# Full (post-backbone) MANIQA forward
# -----------------------------------------------------------------------------
def maniqa_forward(feat, params):
    # feat: (B, N_patches, 4*embed_dim) -- extracted ViT feature (blocks 6..9).
    x = jnp.transpose(feat, (0, 2, 1))              # 'b (h w) c -> b c (h w)'
    for p in params["tab1"]:
        x = tablock(x, *p)
    x = conv1x1(x, params["conv1_w"], params["conv1_b"])
    # TODO(synk): swintransformer1 (custom module, no source) -> identity.
    for p in params["tab2"]:
        x = tablock(x, *p)
    x = conv1x1(x, params["conv2_w"], params["conv2_b"])
    # TODO(synk): swintransformer2 (no source) -> identity.
    x = jnp.transpose(x, (0, 2, 1))                 # 'b c (h w) -> b (h w) c'
    return head(x, *params["fc_score"], *params["fc_weight"])


# -----------------------------------------------------------------------------
# Pure-JAX f32 reference (matches the PyTorch math; kernels use bf16 MXU inputs
# and bf16 stage outputs, so comparison tolerance is mixed-precision scale).
# -----------------------------------------------------------------------------
def _ref_tablock(x, wq, bq, wk, bk, wv, bv):
    B, C, N = x.shape
    q = x @ wq.T + bq
    k = x @ wk.T + bk
    v = x @ wv.T + bv
    attn = jax.nn.softmax((q @ jnp.swapaxes(k, -2, -1)) * N ** (-0.5), axis=-1)
    y = attn @ v
    z = jnp.swapaxes(y, 1, 2).reshape(B, C, N)
    return z + x


def ref_forward(feat, params):
    x = jnp.transpose(feat, (0, 2, 1))
    for p in params["tab1"]:
        x = _ref_tablock(x, *p)
    x = jnp.einsum('oc,bcn->bon', params["conv1_w"], x) + params["conv1_b"][None, :, None]
    for p in params["tab2"]:
        x = _ref_tablock(x, *p)
    x = jnp.einsum('oc,bcn->bon', params["conv2_w"], x) + params["conv2_b"][None, :, None]
    x = jnp.transpose(x, (0, 2, 1))
    w1s, b1s, w2s, b2s = params["fc_score"]
    w1w, b1w, w2w, b2w = params["fc_weight"]
    scores = []
    for i in range(x.shape[0]):
        xi = x[i]
        f = jnp.maximum(jnp.maximum(xi @ w1s.T + b1s, 0.0) @ w2s.T + b2s, 0.0)
        w = jax.nn.sigmoid(jnp.maximum(xi @ w1w.T + b1w, 0.0) @ w2w.T + b2w)
        scores.append(jnp.sum(f * w) / jnp.sum(w))
    return jnp.stack(scores)


# -----------------------------------------------------------------------------
# Deterministic parameter init
# -----------------------------------------------------------------------------
def _linear(key, out_f, in_f, scale=0.05):
    kw, kb = jax.random.split(key)
    return (jax.random.normal(kw, (out_f, in_f), jnp.float32) * scale,
            jax.random.normal(kb, (out_f,), jnp.float32) * scale)


def init_params(key, embed_dim, n_tokens, num_tab=2):
    keys = iter(jax.random.split(key, 32))
    p = {"tab1": [], "tab2": []}
    for _ in range(num_tab):
        wq, bq = _linear(next(keys), n_tokens, n_tokens)
        wk, bk = _linear(next(keys), n_tokens, n_tokens)
        wv, bv = _linear(next(keys), n_tokens, n_tokens)
        p["tab1"].append((wq, bq, wk, bk, wv, bv))
    p["conv1_w"], p["conv1_b"] = _linear(next(keys), embed_dim, embed_dim * 4)
    for _ in range(num_tab):
        wq, bq = _linear(next(keys), n_tokens, n_tokens)
        wk, bk = _linear(next(keys), n_tokens, n_tokens)
        wv, bv = _linear(next(keys), n_tokens, n_tokens)
        p["tab2"].append((wq, bq, wk, bk, wv, bv))
    p["conv2_w"], p["conv2_b"] = _linear(next(keys), embed_dim // 2, embed_dim)
    dh = embed_dim // 2
    w1s, b1s = _linear(next(keys), dh, dh)
    w2s, b2s = _linear(next(keys), 1, dh)
    p["fc_score"] = (w1s, b1s, w2s, b2s)
    w1w, b1w = _linear(next(keys), dh, dh)
    w2w, b2w = _linear(next(keys), 1, dh)
    p["fc_weight"] = (w1w, b1w, w2w, b2w)
    return p


if __name__ == "__main__":
    # Small shapes consistent with the module:
    #   img_size=32, patch_size=8 -> input_size=4, N = 4*4 = 16 tokens
    #   embed_dim=16 -> ViT-extracted feature channels = 4*embed_dim = 64
    B, embed_dim, input_size = 2, 16, 4
    n_tokens = input_size * input_size

    _buffered1_supported()   # probe once, outside of jit tracing

    key = jax.random.PRNGKey(0)
    k_feat, k_params = jax.random.split(key)
    feat = jax.random.normal(k_feat, (B, n_tokens, 4 * embed_dim), jnp.float32)
    params = init_params(k_params, embed_dim, n_tokens)

    fwd = jax.jit(maniqa_forward)
    score = jax.block_until_ready(fwd(feat, params))

    ref = jax.block_until_ready(ref_forward(feat, params))
    assert score.shape == (B,)
    # Kernels use bf16 MXU inputs, bf16 stage outputs (f32 accumulation) and an
    # approx softmax reciprocal; compare at mixed-precision tolerance.
    np.testing.assert_allclose(np.asarray(score), np.asarray(ref),
                               rtol=3e-2, atol=3e-2)
    print("KERNEL_OK")
</pallas_src>

<mosaic_0001>
module attributes {stable_mosaic.version = 11 : i64} {
  func.func @_k(%arg0: i32, %arg1: memref<8x128xf32, #tpu.memory_space<vmem>>, %arg2: memref<8x128xf32, #tpu.memory_space<vmem>>) attributes {dimension_semantics = [#tpu.dimension_semantics<arbitrary>], iteration_bounds = array<i64: 2>, scalar_prefetch = 0 : i64, scratch_operands = 0 : i64, tpu.core_type = #tpu.core_type<tc>, window_params = [{pipeline_mode = #tpu.pipeline_mode<synchronous>, transform_indices = @transform_0, window_bounds = array<i64: 8, 128>}, {pipeline_mode = #tpu.pipeline_mode<synchronous>, transform_indices = @transform_1, window_bounds = array<i64: 8, 128>}]} {
    %c0 = arith.constant 0 : index
    %c0_0 = arith.constant 0 : index
    %0 = vector.load %arg1[%c0, %c0_0] : memref<8x128xf32, #tpu.memory_space<vmem>>, vector<8x128xf32>
    %cst = arith.constant 1.000000e+00 : f32
    %1 = vector.broadcast %cst : f32 to vector<8x128xf32>
    %2 = arith.addf %0, %1 : vector<8x128xf32>
    %c0_1 = arith.constant 0 : index
    %c0_2 = arith.constant 0 : index
    %3 = vector.load %arg2[%c0_1, %c0_2] : memref<8x128xf32, #tpu.memory_space<vmem>>, vector<8x128xf32>
    tpu.vector_store %arg2[%c0_1, %c0_2], %2 {strides = array<i32>} : memref<8x128xf32, #tpu.memory_space<vmem>>, vector<8x128xf32>,
    return
  }
  func.func @transform_0(%arg0: i32) -> (i32, i32) {
    %c0_i32 = arith.constant 0 : i32
    %c0_i32_0 = arith.constant 0 : i32
    %c0_i32_1 = arith.constant 0 : i32
    return %c0_i32, %c0_i32_0 : i32, i32
  }
  func.func @transform_1(%arg0: i32) -> (i32, i32) {
    %c0_i32 = arith.constant 0 : i32
    %c0_i32_0 = arith.constant 0 : i32
    %c0_i32_1 = arith.constant 0 : i32
    return %c0_i32, %c0_i32_0 : i32, i32
  }
}

module attributes {stable_mosaic.version = 11 : i64} {
  func.func @_tab_attn_kernel(%arg0: i32, %arg1: i32, %arg2: memref<1x64x128xbf16, #tpu.memory_space<vmem>>, %arg3: memref<128x128xbf16, #tpu.memory_space<vmem>>, %arg4: memref<1x128xf32, #tpu.memory_space<vmem>>, %arg5: memref<1x64x128xbf16, #tpu.memory_space<vmem>>, %arg6: memref<1x128x64xbf16, #tpu.memory_space<vmem>>, %arg7: memref<1x128x64xbf16, #tpu.memory_space<vmem>>) attributes {dimension_semantics = [#tpu.dimension_semantics<parallel>, #tpu.dimension_semantics<parallel>], iteration_bounds = array<i64: 2, 1>, scalar_prefetch = 0 : i64, scratch_operands = 0 : i64, tpu.core_type = #tpu.core_type<tc>, window_params = [{transform_indices = @transform_0, window_bounds = array<i64: 1, 64, 128>}, {pipeline_mode = #tpu.pipeline_mode<synchronous>, transform_indices = @transform_1, window_bounds = array<i64: 128, 128>}, {pipeline_mode = #tpu.pipeline_mode<synchronous>, transform_indices = @transform_2, window_bounds = array<i64: 1, 128>}, {transform_indices = @transform_3, window_bounds = array<i64: 1, 64, 128>}, {transform_indices = @transform_4, window_bounds = array<i64: 1, 128, 64>}, {transform_indices = @transform_5, window_bounds = array<i64: 1, 128, 64>}]} {
    %c0 = arith.constant 0 : index
    %c0_0 = arith.constant 0 : index
    %c0_1 = arith.constant 0 : index
    %0 = vector.load %arg2[%c0, %c0_0, %c0_1] : memref<1x64x128xbf16, #tpu.memory_space<vmem>>, vector<1x64x128xbf16>
    %1 = vector.shape_cast %0 : vector<1x64x128xbf16> to vector<64x128xbf16>
    %c0_2 = arith.constant 0 : index
    %c0_3 = arith.constant 0 : index
    %2 = vector.load %arg3[%c0_2, %c0_3] : memref<128x128xbf16, #tpu.memory_space<vmem>>, vector<128x128xbf16>
    %cst = arith.constant dense<0.000000e+00> : vector<64x128xf32>
    %3 = tpu.matmul %1, %2, %cst {dimension_numbers = #tpu.dot_dimension_numbers<[1], [0], [0], [1], [0, 0, 1, 1], [], []>} : vector<64x128xbf16>, vector<128x128xbf16>, vector<64x128xf32> -> vector<64x128xf32>
    %c0_4 = arith.constant 0 : index
    %c0_5 = arith.constant 0 : index
    %4 = vector.load %arg4[%c0_4, %c0_5] : memref<1x128xf32, #tpu.memory_space<vmem>>, vector<1x128xf32>
    %5 = vector.broadcast %4 : vector<1x128xf32> to vector<64x128xf32>
    %6 = arith.addf %3, %5 : vector<64x128xf32>
    %7 = arith.truncf %6 : vector<64x128xf32> to vector<64x128xbf16>
    %c0_6 = arith.constant 0 : index
    %c0_7 = arith.constant 0 : index
    %c0_8 = arith.constant 0 : index
    %8 = vector.load %arg5[%c0_6, %c0_7, %c0_8] : memref<1x64x128xbf16, #tpu.memory_space<vmem>>, vector<1x64x128xbf16>
    %9 = vector.shape_cast %8 : vector<1x64x128xbf16> to vector<64x128xbf16>
    %cst_9 = arith.constant dense<0.000000e+00> : vector<64x64xf32>
    %10 = tpu.matmul %7, %9, %cst_9 {dimension_numbers = #tpu.dot_dimension_numbers<[1], [1], [0], [0], [0, 0, 1, 0], [], []>} : vector<64x128xbf16>, vector<64x128xbf16>, vector<64x64xf32> -> vector<64x64xf32>
    %cst_10 = arith.constant dense<0xFF800000> : vector<64xf32>
    %11 = vector.multi_reduction <maximumf>, %10, %cst_10 [1] : vector<64x64xf32> to vector<64xf32>
    %12 = vector.shape_cast %11 : vector<64xf32> to vector<64x1xf32>
    %13 = vector.broadcast %12 : vector<64x1xf32> to vector<64x64xf32>
    %14 = arith.subf %10, %13 : vector<64x64xf32>
    %15 = math.exp %14 : vector<64x64xf32>
    %cst_11 = arith.constant dense<0.000000e+00> : vector<64xf32>
    %16 = vector.multi_reduction <add>, %15, %cst_11 [1] : vector<64x64xf32> to vector<64xf32>
    %17 = vector.shape_cast %16 : vector<64xf32> to vector<64x1xf32>
    %18 = tpu.reciprocal %17 {approx = true} : vector<64x1xf32> -> vector<64x1xf32>
    %19 = vector.broadcast %18 : vector<64x1xf32> to vector<64x64xf32>
    %20 = arith.mulf %15, %19 : vector<64x64xf32>
    %c0_12 = arith.constant 0 : index
    %c0_13 = arith.constant 0 : index
    %c0_14 = arith.constant 0 : index
    %21 = vector.load %arg6[%c0_12, %c0_13, %c0_14] : memref<1x128x64xbf16, #tpu.memory_space<vmem>>, vector<1x128x64xbf16>
    %22 = vector.shape_cast %21 : vector<1x128x64xbf16> to vector<128x64xbf16>
    %23 = arith.truncf %20 : vector<64x64xf32> to vector<64x64xbf16>
    %cst_15 = arith.constant dense<0.000000e+00> : vector<128x64xf32>
    %24 = tpu.matmul %22, %23, %cst_15 {dimension_numbers = #tpu.dot_dimension_numbers<[1], [1], [0], [0], [0, 0, 1, 0], [], []>} : vector<128x64xbf16>, vector<64x64xbf16>, vector<128x64xf32> -> vector<128x64xf32>
    %25 = arith.truncf %24 : vector<128x64xf32> to vector<128x64xbf16>
    %c0_16 = arith.constant 0 : index
    %c0_17 = arith.constant 0 : index
    %c0_18 = arith.constant 0 : index
    %26 = vector.load %arg7[%c0_16, %c0_17, %c0_18] : memref<1x128x64xbf16, #tpu.memory_space<vmem>>, vector<1x128x64xbf16>
    %27 = vector.shape_cast %26 : vector<1x128x64xbf16> to vector<128x64xbf16>
    %28 = vector.shape_cast %25 : vector<128x64xbf16> to vector<1x128x64xbf16>
    tpu.vector_store %arg7[%c0_16, %c0_17, %c0_18], %28 {strides = array<i32>} : memref<1x128x64xbf16, #tpu.memory_space<vmem>>, vector<1x128x64xbf16>,
    return
  }
  func.func @transform_0(%arg0: i32, %arg1: i32) -> (i32, i32, i32) {
    %c0_i32 = arith.constant 0 : i32
    %c0_i32_0 = arith.constant 0 : i32
    return %arg0, %arg1, %c0_i32 : i32, i32, i32
  }
  func.func @transform_1(%arg0: i32, %arg1: i32) -> (i32, i32) {
    %c0_i32 = arith.constant 0 : i32
    %c0_i32_0 = arith.constant 0 : i32
    %c0_i32_1 = arith.constant 0 : i32
    return %c0_i32, %c0_i32_0 : i32, i32
  }
  func.func @transform_2(%arg0: i32, %arg1: i32) -> (i32, i32) {
    %c0_i32 = arith.constant 0 : i32
    %c0_i32_0 = arith.constant 0 : i32
    %c0_i32_1 = arith.constant 0 : i32
    return %c0_i32, %c0_i32_0 : i32, i32
  }
  func.func @transform_3(%arg0: i32, %arg1: i32) -> (i32, i32, i32) {
    %c0_i32 = arith.constant 0 : i32
    %c0_i32_0 = arith.constant 0 : i32
    %c0_i32_1 = arith.constant 0 : i32
    return %arg0, %c0_i32, %c0_i32_0 : i32, i32, i32
  }
  func.func @transform_4(%arg0: i32, %arg1: i32) -> (i32, i32, i32) {
    %c0_i32 = arith.constant 0 : i32
    %c0_i32_0 = arith.constant 0 : i32
    %c0_i32_1 = arith.constant 0 : i32
    return %arg0, %c0_i32, %c0_i32_0 : i32, i32, i32
  }
  func.func @transform_5(%arg0: i32, %arg1: i32) -> (i32, i32, i32) {
    %c0_i32 = arith.constant 0 : i32
    %c0_i32_0 = arith.constant 0 : i32
    return %arg0, %c0_i32, %arg1 : i32, i32, i32
  }
}

module attributes {stable_mosaic.version = 11 : i64} {
  func.func @_kv_proj_kernel(%arg0: i32, %arg1: i32, %arg2: memref<1x64x128xbf16, #tpu.memory_space<vmem>>, %arg3: memref<128x128xbf16, #tpu.memory_space<vmem>>, %arg4: memref<1x128xf32, #tpu.memory_space<vmem>>, %arg5: memref<128x128xbf16, #tpu.memory_space<vmem>>, %arg6: memref<128x1xf32, #tpu.memory_space<vmem>>, %arg7: memref<1x64x128xbf16, #tpu.memory_space<vmem>>, %arg8: memref<1x128x64xbf16, #tpu.memory_space<vmem>>) attributes {dimension_semantics = [#tpu.dimension_semantics<parallel>, #tpu.dimension_semantics<parallel>], iteration_bounds = array<i64: 2, 1>, scalar_prefetch = 0 : i64, scratch_operands = 0 : i64, tpu.core_type = #tpu.core_type<tc>, window_params = [{transform_indices = @transform_0, window_bounds = array<i64: 1, 64, 128>}, {pipeline_mode = #tpu.pipeline_mode<synchronous>, transform_indices = @transform_1, window_bounds = array<i64: 128, 128>}, {pipeline_mode = #tpu.pipeline_mode<synchronous>, transform_indices = @transform_2, window_bounds = array<i64: 1, 128>}, {pipeline_mode = #tpu.pipeline_mode<synchronous>, transform_indices = @transform_3, window_bounds = array<i64: 128, 128>}, {pipeline_mode = #tpu.pipeline_mode<synchronous>, transform_indices = @transform_4, window_bounds = array<i64: 128, 1>}, {transform_indices = @transform_5, window_bounds = array<i64: 1, 64, 128>}, {transform_indices = @transform_6, window_bounds = array<i64: 1, 128, 64>}]} {
    %c0 = arith.constant 0 : index
    %c0_0 = arith.constant 0 : index
    %c0_1 = arith.constant 0 : index
    %0 = vector.load %arg2[%c0, %c0_0, %c0_1] : memref<1x64x128xbf16, #tpu.memory_space<vmem>>, vector<1x64x128xbf16>
    %1 = vector.shape_cast %0 : vector<1x64x128xbf16> to vector<64x128xbf16>
    %c0_2 = arith.constant 0 : index
    %c0_3 = arith.constant 0 : index
    %2 = vector.load %arg3[%c0_2, %c0_3] : memref<128x128xbf16, #tpu.memory_space<vmem>>, vector<128x128xbf16>
    %cst = arith.constant dense<0.000000e+00> : vector<64x128xf32>
    %3 = tpu.matmul %1, %2, %cst {dimension_numbers = #tpu.dot_dimension_numbers<[1], [0], [0], [1], [0, 0, 1, 1], [], []>} : vector<64x128xbf16>, vector<128x128xbf16>, vector<64x128xf32> -> vector<64x128xf32>
    %c0_4 = arith.constant 0 : index
    %c0_5 = arith.constant 0 : index
    %4 = vector.load %arg4[%c0_4, %c0_5] : memref<1x128xf32, #tpu.memory_space<vmem>>, vector<1x128xf32>
    %5 = vector.broadcast %4 : vector<1x128xf32> to vector<64x128xf32>
    %6 = arith.addf %3, %5 : vector<64x128xf32>
    %7 = arith.truncf %6 : vector<64x128xf32> to vector<64x128xbf16>
    %c0_6 = arith.constant 0 : index
    %c0_7 = arith.constant 0 : index
    %c0_8 = arith.constant 0 : index
    %8 = vector.load %arg7[%c0_6, %c0_7, %c0_8] : memref<1x64x128xbf16, #tpu.memory_space<vmem>>, vector<1x64x128xbf16>
    %9 = vector.shape_cast %8 : vector<1x64x128xbf16> to vector<64x128xbf16>
    %10 = vector.shape_cast %7 : vector<64x128xbf16> to vector<1x64x128xbf16>
    tpu.vector_store %arg7[%c0_6, %c0_7, %c0_8], %10 {strides = array<i32>} : memref<1x64x128xbf16, #tpu.memory_space<vmem>>, vector<1x64x128xbf16>,
    %c0_9 = arith.constant 0 : index
    %c0_10 = arith.constant 0 : index
    %11 = vector.load %arg5[%c0_9, %c0_10] : memref<128x128xbf16, #tpu.memory_space<vmem>>, vector<128x128xbf16>
    %cst_11 = arith.constant dense<0.000000e+00> : vector<128x64xf32>
    %12 = tpu.matmul %11, %1, %cst_11 {dimension_numbers = #tpu.dot_dimension_numbers<[1], [1], [0], [0], [0, 0, 1, 0], [], []>} : vector<128x128xbf16>, vector<64x128xbf16>, vector<128x64xf32> -> vector<128x64xf32>
    %c0_12 = arith.constant 0 : index
    %c0_13 = arith.constant 0 : index
    %13 = vector.load %arg6[%c0_12, %c0_13] : memref<128x1xf32, #tpu.memory_space<vmem>>, vector<128x1xf32>
    %14 = vector.broadcast %13 : vector<128x1xf32> to vector<128x64xf32>
    %15 = arith.addf %12, %14 : vector<128x64xf32>
    %16 = arith.truncf %15 : vector<128x64xf32> to vector<128x64xbf16>
    %c0_14 = arith.constant 0 : index
    %c0_15 = arith.constant 0 : index
    %c0_16 = arith.constant 0 : index
    %17 = vector.load %arg8[%c0_14, %c0_15, %c0_16] : memref<1x128x64xbf16, #tpu.memory_space<vmem>>, vector<1x128x64xbf16>
    %18 = vector.shape_cast %17 : vector<1x128x64xbf16> to vector<128x64xbf16>
    %19 = vector.shape_cast %16 : vector<128x64xbf16> to vector<1x128x64xbf16>
    tpu.vector_store %arg8[%c0_14, %c0_15, %c0_16], %19 {strides = array<i32>} : memref<1x128x64xbf16, #tpu.memory_space<vmem>>, vector<1x128x64xbf16>,
    return
  }
  func.func @transform_0(%arg0: i32, %arg1: i32) -> (i32, i32, i32) {
    %c0_i32 = arith.constant 0 : i32
    %c0_i32_0 = arith.constant 0 : i32
    return %arg0, %arg1, %c0_i32 : i32, i32, i32
  }
  func.func @transform_1(%arg0: i32, %arg1: i32) -> (i32, i32) {
    %c0_i32 = arith.constant 0 : i32
    %c0_i32_0 = arith.constant 0 : i32
    %c0_i32_1 = arith.constant 0 : i32
    return %c0_i32, %c0_i32_0 : i32, i32
  }
  func.func @transform_2(%arg0: i32, %arg1: i32) -> (i32, i32) {
    %c0_i32 = arith.constant 0 : i32
    %c0_i32_0 = arith.constant 0 : i32
    %c0_i32_1 = arith.constant 0 : i32
    return %c0_i32, %c0_i32_0 : i32, i32
  }
  func.func @transform_3(%arg0: i32, %arg1: i32) -> (i32, i32) {
    %c0_i32 = arith.constant 0 : i32
    %c0_i32_0 = arith.constant 0 : i32
    %c0_i32_1 = arith.constant 0 : i32
    return %c0_i32, %c0_i32_0 : i32, i32
  }
  func.func @transform_4(%arg0: i32, %arg1: i32) -> (i32, i32) {
    %c0_i32 = arith.constant 0 : i32
    %c0_i32_0 = arith.constant 0 : i32
    %c0_i32_1 = arith.constant 0 : i32
    return %c0_i32, %c0_i32_0 : i32, i32
  }
  func.func @transform_5(%arg0: i32, %arg1: i32) -> (i32, i32, i32) {
    %c0_i32 = arith.constant 0 : i32
    %c0_i32_0 = arith.constant 0 : i32
    return %arg0, %arg1, %c0_i32 : i32, i32, i32
  }
  func.func @transform_6(%arg0: i32, %arg1: i32) -> (i32, i32, i32) {
    %c0_i32 = arith.constant 0 : i32
    %c0_i32_0 = arith.constant 0 : i32
    return %arg0, %c0_i32, %arg1 : i32, i32, i32
  }
}

module attributes {stable_mosaic.version = 11 : i64} {
  func.func @_conv1x1_kernel(%arg0: i32, %arg1: i32, %arg2: memref<1x64x128xbf16, #tpu.memory_space<vmem>>, %arg3: memref<16x64xbf16, #tpu.memory_space<vmem>>, %arg4: memref<16x1xf32, #tpu.memory_space<vmem>>, %arg5: memref<1x16x128xbf16, #tpu.memory_space<vmem>>) attributes {dimension_semantics = [#tpu.dimension_semantics<parallel>, #tpu.dimension_semantics<parallel>], iteration_bounds = array<i64: 2, 1>, scalar_prefetch = 0 : i64, scratch_operands = 0 : i64, tpu.core_type = #tpu.core_type<tc>, window_params = [{transform_indices = @transform_0, window_bounds = array<i64: 1, 64, 128>}, {transform_indices = @transform_1, window_bounds = array<i64: 16, 64>}, {transform_indices = @transform_2, window_bounds = array<i64: 16, 1>}, {transform_indices = @transform_3, window_bounds = array<i64: 1, 16, 128>}]} {
    %c0 = arith.constant 0 : index
    %c0_0 = arith.constant 0 : index
    %0 = vector.load %arg3[%c0, %c0_0] : memref<16x64xbf16, #tpu.memory_space<vmem>>, vector<16x64xbf16>
    %c0_1 = arith.constant 0 : index
    %c0_2 = arith.constant 0 : index
    %c0_3 = arith.constant 0 : index
    %1 = vector.load %arg2[%c0_1, %c0_2, %c0_3] : memref<1x64x128xbf16, #tpu.memory_space<vmem>>, vector<1x64x128xbf16>
    %2 = vector.shape_cast %1 : vector<1x64x128xbf16> to vector<64x128xbf16>
    %cst = arith.constant dense<0.000000e+00> : vector<16x128xf32>
    %3 = tpu.matmul %0, %2, %cst {dimension_numbers = #tpu.dot_dimension_numbers<[1], [0], [0], [1], [0, 0, 1, 1], [], []>} : vector<16x64xbf16>, vector<64x128xbf16>, vector<16x128xf32> -> vector<16x128xf32>
    %c0_4 = arith.constant 0 : index
    %c0_5 = arith.constant 0 : index
    %4 = vector.load %arg4[%c0_4, %c0_5] : memref<16x1xf32, #tpu.memory_space<vmem>>, vector<16x1xf32>
    %5 = vector.broadcast %4 : vector<16x1xf32> to vector<16x128xf32>
    %6 = arith.addf %3, %5 : vector<16x128xf32>
    %7 = arith.truncf %6 : vector<16x128xf32> to vector<16x128xbf16>
    %c0_6 = arith.constant 0 : index
    %c0_7 = arith.constant 0 : index
    %c0_8 = arith.constant 0 : index
    %8 = vector.load %arg5[%c0_6, %c0_7, %c0_8] : memref<1x16x128xbf16, #tpu.memory_space<vmem>>, vector<1x16x128xbf16>
    %9 = vector.shape_cast %8 : vector<1x16x128xbf16> to vector<16x128xbf16>
    %10 = vector.shape_cast %7 : vector<16x128xbf16> to vector<1x16x128xbf16>
    tpu.vector_store %arg5[%c0_6, %c0_7, %c0_8], %10 {strides = array<i32>} : memref<1x16x128xbf16, #tpu.memory_space<vmem>>, vector<1x16x128xbf16>,
    return
  }
  func.func @transform_0(%arg0: i32, %arg1: i32) -> (i32, i32, i32) {
    %c0_i32 = arith.constant 0 : i32
    %c0_i32_0 = arith.constant 0 : i32
    %c0_i32_1 = arith.constant 0 : i32
    return %arg0, %c0_i32, %c0_i32_0 : i32, i32, i32
  }
  func.func @transform_1(%arg0: i32, %arg1: i32) -> (i32, i32) {
    %c0_i32 = arith.constant 0 : i32
    %c0_i32_0 = arith.constant 0 : i32
    return %arg1, %c0_i32 : i32, i32
  }
  func.func @transform_2(%arg0: i32, %arg1: i32) -> (i32, i32) {
    %c0_i32 = arith.constant 0 : i32
    %c0_i32_0 = arith.constant 0 : i32
    return %arg1, %c0_i32 : i32, i32
  }
  func.func @transform_3(%arg0: i32, %arg1: i32) -> (i32, i32, i32) {
    %c0_i32 = arith.constant 0 : i32
    %c0_i32_0 = arith.constant 0 : i32
    return %arg0, %arg1, %c0_i32 : i32, i32, i32
  }
}

module attributes {stable_mosaic.version = 11 : i64} {
  func.func @_kv_proj_kernel(%arg0: i32, %arg1: i32, %arg2: memref<1x16x128xbf16, #tpu.memory_space<vmem>>, %arg3: memref<128x128xbf16, #tpu.memory_space<vmem>>, %arg4: memref<1x128xf32, #tpu.memory_space<vmem>>, %arg5: memref<128x128xbf16, #tpu.memory_space<vmem>>, %arg6: memref<128x1xf32, #tpu.memory_space<vmem>>, %arg7: memref<1x16x128xbf16, #tpu.memory_space<vmem>>, %arg8: memref<1x128x16xbf16, #tpu.memory_space<vmem>>) attributes {dimension_semantics = [#tpu.dimension_semantics<parallel>, #tpu.dimension_semantics<parallel>], iteration_bounds = array<i64: 2, 1>, scalar_prefetch = 0 : i64, scratch_operands = 0 : i64, tpu.core_type = #tpu.core_type<tc>, window_params = [{transform_indices = @transform_0, window_bounds = array<i64: 1, 16, 128>}, {pipeline_mode = #tpu.pipeline_mode<synchronous>, transform_indices = @transform_1, window_bounds = array<i64: 128, 128>}, {pipeline_mode = #tpu.pipeline_mode<synchronous>, transform_indices = @transform_2, window_bounds = array<i64: 1, 128>}, {pipeline_mode = #tpu.pipeline_mode<synchronous>, transform_indices = @transform_3, window_bounds = array<i64: 128, 128>}, {pipeline_mode = #tpu.pipeline_mode<synchronous>, transform_indices = @transform_4, window_bounds = array<i64: 128, 1>}, {transform_indices = @transform_5, window_bounds = array<i64: 1, 16, 128>}, {transform_indices = @transform_6, window_bounds = array<i64: 1, 128, 16>}]} {
    %c0 = arith.constant 0 : index
    %c0_0 = arith.constant 0 : index
    %c0_1 = arith.constant 0 : index
    %0 = vector.load %arg2[%c0, %c0_0, %c0_1] : memref<1x16x128xbf16, #tpu.memory_space<vmem>>, vector<1x16x128xbf16>
    %1 = vector.shape_cast %0 : vector<1x16x128xbf16> to vector<16x128xbf16>
    %c0_2 = arith.constant 0 : index
    %c0_3 = arith.constant 0 : index
    %2 = vector.load %arg3[%c0_2, %c0_3] : memref<128x128xbf16, #tpu.memory_space<vmem>>, vector<128x128xbf16>
    %cst = arith.constant dense<0.000000e+00> : vector<16x128xf32>
    %3 = tpu.matmul %1, %2, %cst {dimension_numbers = #tpu.dot_dimension_numbers<[1], [0], [0], [1], [0, 0, 1, 1], [], []>} : vector<16x128xbf16>, vector<128x128xbf16>, vector<16x128xf32> -> vector<16x128xf32>
    %c0_4 = arith.constant 0 : index
    %c0_5 = arith.constant 0 : index
    %4 = vector.load %arg4[%c0_4, %c0_5] : memref<1x128xf32, #tpu.memory_space<vmem>>, vector<1x128xf32>
    %5 = vector.broadcast %4 : vector<1x128xf32> to vector<16x128xf32>
    %6 = arith.addf %3, %5 : vector<16x128xf32>
    %7 = arith.truncf %6 : vector<16x128xf32> to vector<16x128xbf16>
    %c0_6 = arith.constant 0 : index
    %c0_7 = arith.constant 0 : index
    %c0_8 = arith.constant 0 : index
    %8 = vector.load %arg7[%c0_6, %c0_7, %c0_8] : memref<1x16x128xbf16, #tpu.memory_space<vmem>>, vector<1x16x128xbf16>
    %9 = vector.shape_cast %8 : vector<1x16x128xbf16> to vector<16x128xbf16>
    %10 = vector.shape_cast %7 : vector<16x128xbf16> to vector<1x16x128xbf16>
    tpu.vector_store %arg7[%c0_6, %c0_7, %c0_8], %10 {strides = array<i32>} : memref<1x16x128xbf16, #tpu.memory_space<vmem>>, vector<1x16x128xbf16>,
    %c0_9 = arith.constant 0 : index
    %c0_10 = arith.constant 0 : index
    %11 = vector.load %arg5[%c0_9, %c0_10] : memref<128x128xbf16, #tpu.memory_space<vmem>>, vector<128x128xbf16>
    %cst_11 = arith.constant dense<0.000000e+00> : vector<128x16xf32>
    %12 = tpu.matmul %11, %1, %cst_11 {dimension_numbers = #tpu.dot_dimension_numbers<[1], [1], [0], [0], [0, 0, 1, 0], [], []>} : vector<128x128xbf16>, vector<16x128xbf16>, vector<128x16xf32> -> vector<128x16xf32>
    %c0_12 = arith.constant 0 : index
    %c0_13 = arith.constant 0 : index
    %13 = vector.load %arg6[%c0_12, %c0_13] : memref<128x1xf32, #tpu.memory_space<vmem>>, vector<128x1xf32>
    %14 = vector.broadcast %13 : vector<128x1xf32> to vector<128x16xf32>
    %15 = arith.addf %12, %14 : vector<128x16xf32>
    %16 = arith.truncf %15 : vector<128x16xf32> to vector<128x16xbf16>
    %c0_14 = arith.constant 0 : index
    %c0_15 = arith.constant 0 : index
    %c0_16 = arith.constant 0 : index
    %17 = vector.load %arg8[%c0_14, %c0_15, %c0_16] : memref<1x128x16xbf16, #tpu.memory_space<vmem>>, vector<1x128x16xbf16>
    %18 = vector.shape_cast %17 : vector<1x128x16xbf16> to vector<128x16xbf16>
    %19 = vector.shape_cast %16 : vector<128x16xbf16> to vector<1x128x16xbf16>
    tpu.vector_store %arg8[%c0_14, %c0_15, %c0_16], %19 {strides = array<i32>} : memref<1x128x16xbf16, #tpu.memory_space<vmem>>, vector<1x128x16xbf16>,
    return
  }
  func.func @transform_0(%arg0: i32, %arg1: i32) -> (i32, i32, i32) {
    %c0_i32 = arith.constant 0 : i32
    %c0_i32_0 = arith.constant 0 : i32
    return %arg0, %arg1, %c0_i32 : i32, i32, i32
  }
  func.func @transform_1(%arg0: i32, %arg1: i32) -> (i32, i32) {
    %c0_i32 = arith.constant 0 : i32
    %c0_i32_0 = arith.constant 0 : i32
    %c0_i32_1 = arith.constant 0 : i32
    return %c0_i32, %c0_i32_0 : i32, i32
  }
  func.func @transform_2(%arg0: i32, %arg1: i32) -> (i32, i32) {
    %c0_i32 = arith.constant 0 : i32
    %c0_i32_0 = arith.constant 0 : i32
    %c0_i32_1 = arith.constant 0 : i32
    return %c0_i32, %c0_i32_0 : i32, i32
  }
  func.func @transform_3(%arg0: i32, %arg1: i32) -> (i32, i32) {
    %c0_i32 = arith.constant 0 : i32
    %c0_i32_0 = arith.constant 0 : i32
    %c0_i32_1 = arith.constant 0 : i32
    return %c0_i32, %c0_i32_0 : i32, i32
  }
  func.func @transform_4(%arg0: i32, %arg1: i32) -> (i32, i32) {
    %c0_i32 = arith.constant 0 : i32
    %c0_i32_0 = arith.constant 0 : i32
    %c0_i32_1 = arith.constant 0 : i32
    return %c0_i32, %c0_i32_0 : i32, i32
  }
  func.func @transform_5(%arg0: i32, %arg1: i32) -> (i32, i32, i32) {
    %c0_i32 = arith.constant 0 : i32
    %c0_i32_0 = arith.constant 0 : i32
    return %arg0, %arg1, %c0_i32 : i32, i32, i32
  }
  func.func @transform_6(%arg0: i32, %arg1: i32) -> (i32, i32, i32) {
    %c0_i32 = arith.constant 0 : i32
    %c0_i32_0 = arith.constant 0 : i32
    return %arg0, %c0_i32, %arg1 : i32, i32, i32
  }
}

module attributes {stable_mosaic.version = 11 : i64} {
  func.func @_tab_attn_kernel(%arg0: i32, %arg1: i32, %arg2: memref<1x16x128xbf16, #tpu.memory_space<vmem>>, %arg3: memref<128x128xbf16, #tpu.memory_space<vmem>>, %arg4: memref<1x128xf32, #tpu.memory_space<vmem>>, %arg5: memref<1x16x128xbf16, #tpu.memory_space<vmem>>, %arg6: memref<1x128x16xbf16, #tpu.memory_space<vmem>>, %arg7: memref<1x128x16xbf16, #tpu.memory_space<vmem>>) attributes {dimension_semantics = [#tpu.dimension_semantics<parallel>, #tpu.dimension_semantics<parallel>], iteration_bounds = array<i64: 2, 1>, scalar_prefetch = 0 : i64, scratch_operands = 0 : i64, tpu.core_type = #tpu.core_type<tc>, window_params = [{transform_indices = @transform_0, window_bounds = array<i64: 1, 16, 128>}, {pipeline_mode = #tpu.pipeline_mode<synchronous>, transform_indices = @transform_1, window_bounds = array<i64: 128, 128>}, {pipeline_mode = #tpu.pipeline_mode<synchronous>, transform_indices = @transform_2, window_bounds = array<i64: 1, 128>}, {transform_indices = @transform_3, window_bounds = array<i64: 1, 16, 128>}, {transform_indices = @transform_4, window_bounds = array<i64: 1, 128, 16>}, {transform_indices = @transform_5, window_bounds = array<i64: 1, 128, 16>}]} {
    %c0 = arith.constant 0 : index
    %c0_0 = arith.constant 0 : index
    %c0_1 = arith.constant 0 : index
    %0 = vector.load %arg2[%c0, %c0_0, %c0_1] : memref<1x16x128xbf16, #tpu.memory_space<vmem>>, vector<1x16x128xbf16>
    %1 = vector.shape_cast %0 : vector<1x16x128xbf16> to vector<16x128xbf16>
    %c0_2 = arith.constant 0 : index
    %c0_3 = arith.constant 0 : index
    %2 = vector.load %arg3[%c0_2, %c0_3] : memref<128x128xbf16, #tpu.memory_space<vmem>>, vector<128x128xbf16>
    %cst = arith.constant dense<0.000000e+00> : vector<16x128xf32>
    %3 = tpu.matmul %1, %2, %cst {dimension_numbers = #tpu.dot_dimension_numbers<[1], [0], [0], [1], [0, 0, 1, 1], [], []>} : vector<16x128xbf16>, vector<128x128xbf16>, vector<16x128xf32> -> vector<16x128xf32>
    %c0_4 = arith.constant 0 : index
    %c0_5 = arith.constant 0 : index
    %4 = vector.load %arg4[%c0_4, %c0_5] : memref<1x128xf32, #tpu.memory_space<vmem>>, vector<1x128xf32>
    %5 = vector.broadcast %4 : vector<1x128xf32> to vector<16x128xf32>
    %6 = arith.addf %3, %5 : vector<16x128xf32>
    %7 = arith.truncf %6 : vector<16x128xf32> to vector<16x128xbf16>
    %c0_6 = arith.constant 0 : index
    %c0_7 = arith.constant 0 : index
    %c0_8 = arith.constant 0 : index
    %8 = vector.load %arg5[%c0_6, %c0_7, %c0_8] : memref<1x16x128xbf16, #tpu.memory_space<vmem>>, vector<1x16x128xbf16>
    %9 = vector.shape_cast %8 : vector<1x16x128xbf16> to vector<16x128xbf16>
    %cst_9 = arith.constant dense<0.000000e+00> : vector<16x16xf32>
    %10 = tpu.matmul %7, %9, %cst_9 {dimension_numbers = #tpu.dot_dimension_numbers<[1], [1], [0], [0], [0, 0, 1, 0], [], []>} : vector<16x128xbf16>, vector<16x128xbf16>, vector<16x16xf32> -> vector<16x16xf32>
    %cst_10 = arith.constant dense<0xFF800000> : vector<16xf32>
    %11 = vector.multi_reduction <maximumf>, %10, %cst_10 [1] : vector<16x16xf32> to vector<16xf32>
    %12 = vector.shape_cast %11 : vector<16xf32> to vector<16x1xf32>
    %13 = vector.broadcast %12 : vector<16x1xf32> to vector<16x16xf32>
    %14 = arith.subf %10, %13 : vector<16x16xf32>
    %15 = math.exp %14 : vector<16x16xf32>
    %cst_11 = arith.constant dense<0.000000e+00> : vector<16xf32>
    %16 = vector.multi_reduction <add>, %15, %cst_11 [1] : vector<16x16xf32> to vector<16xf32>
    %17 = vector.shape_cast %16 : vector<16xf32> to vector<16x1xf32>
    %18 = tpu.reciprocal %17 {approx = true} : vector<16x1xf32> -> vector<16x1xf32>
    %19 = vector.broadcast %18 : vector<16x1xf32> to vector<16x16xf32>
    %20 = arith.mulf %15, %19 : vector<16x16xf32>
    %c0_12 = arith.constant 0 : index
    %c0_13 = arith.constant 0 : index
    %c0_14 = arith.constant 0 : index
    %21 = vector.load %arg6[%c0_12, %c0_13, %c0_14] : memref<1x128x16xbf16, #tpu.memory_space<vmem>>, vector<1x128x16xbf16>
    %22 = vector.shape_cast %21 : vector<1x128x16xbf16> to vector<128x16xbf16>
    %23 = arith.truncf %20 : vector<16x16xf32> to vector<16x16xbf16>
    %cst_15 = arith.constant dense<0.000000e+00> : vector<128x16xf32>
    %24 = tpu.matmul %22, %23, %cst_15 {dimension_numbers = #tpu.dot_dimension_numbers<[1], [1], [0], [0], [0, 0, 1, 0], [], []>} : vector<128x16xbf16>, vector<16x16xbf16>, vector<128x16xf32> -> vector<128x16xf32>
    %25 = arith.truncf %24 : vector<128x16xf32> to vector<128x16xbf16>
    %c0_16 = arith.constant 0 : index
    %c0_17 = arith.constant 0 : index
    %c0_18 = arith.constant 0 : index
    %26 = vector.load %arg7[%c0_16, %c0_17, %c0_18] : memref<1x128x16xbf16, #tpu.memory_space<vmem>>, vector<1x128x16xbf16>
    %27 = vector.shape_cast %26 : vector<1x128x16xbf16> to vector<128x16xbf16>
    %28 = vector.shape_cast %25 : vector<128x16xbf16> to vector<1x128x16xbf16>
    tpu.vector_store %arg7[%c0_16, %c0_17, %c0_18], %28 {strides = array<i32>} : memref<1x128x16xbf16, #tpu.memory_space<vmem>>, vector<1x128x16xbf16>,
    return
  }
  func.func @transform_0(%arg0: i32, %arg1: i32) -> (i32, i32, i32) {
    %c0_i32 = arith.constant 0 : i32
    %c0_i32_0 = arith.constant 0 : i32
    return %arg0, %arg1, %c0_i32 : i32, i32, i32
  }
  func.func @transform_1(%arg0: i32, %arg1: i32) -> (i32, i32) {
    %c0_i32 = arith.constant 0 : i32
    %c0_i32_0 = arith.constant 0 : i32
    %c0_i32_1 = arith.constant 0 : i32
    return %c0_i32, %c0_i32_0 : i32, i32
  }
  func.func @transform_2(%arg0: i32, %arg1: i32) -> (i32, i32) {
    %c0_i32 = arith.constant 0 : i32
    %c0_i32_0 = arith.constant 0 : i32
    %c0_i32_1 = arith.constant 0 : i32
    return %c0_i32, %c0_i32_0 : i32, i32
  }
  func.func @transform_3(%arg0: i32, %arg1: i32) -> (i32, i32, i32) {
    %c0_i32 = arith.constant 0 : i32
    %c0_i32_0 = arith.constant 0 : i32
    %c0_i32_1 = arith.constant 0 : i32
    return %arg0, %c0_i32, %c0_i32_0 : i32, i32, i32
  }
  func.func @transform_4(%arg0: i32, %arg1: i32) -> (i32, i32, i32) {
    %c0_i32 = arith.constant 0 : i32
    %c0_i32_0 = arith.constant 0 : i32
    %c0_i32_1 = arith.constant 0 : i32
    return %arg0, %c0_i32, %c0_i32_0 : i32, i32, i32
  }
  func.func @transform_5(%arg0: i32, %arg1: i32) -> (i32, i32, i32) {
    %c0_i32 = arith.constant 0 : i32
    %c0_i32_0 = arith.constant 0 : i32
    return %arg0, %c0_i32, %arg1 : i32, i32, i32
  }
}

module attributes {stable_mosaic.version = 11 : i64} {
  func.func @_conv1x1_kernel(%arg0: i32, %arg1: i32, %arg2: memref<1x16x128xbf16, #tpu.memory_space<vmem>>, %arg3: memref<8x16xbf16, #tpu.memory_space<vmem>>, %arg4: memref<8x1xf32, #tpu.memory_space<vmem>>, %arg5: memref<1x8x128xbf16, #tpu.memory_space<vmem>>) attributes {dimension_semantics = [#tpu.dimension_semantics<parallel>, #tpu.dimension_semantics<parallel>], iteration_bounds = array<i64: 2, 1>, scalar_prefetch = 0 : i64, scratch_operands = 0 : i64, tpu.core_type = #tpu.core_type<tc>, window_params = [{transform_indices = @transform_0, window_bounds = array<i64: 1, 16, 128>}, {transform_indices = @transform_1, window_bounds = array<i64: 8, 16>}, {transform_indices = @transform_2, window_bounds = array<i64: 8, 1>}, {transform_indices = @transform_3, window_bounds = array<i64: 1, 8, 128>}]} {
    %c0 = arith.constant 0 : index
    %c0_0 = arith.constant 0 : index
    %0 = vector.load %arg3[%c0, %c0_0] : memref<8x16xbf16, #tpu.memory_space<vmem>>, vector<8x16xbf16>
    %c0_1 = arith.constant 0 : index
    %c0_2 = arith.constant 0 : index
    %c0_3 = arith.constant 0 : index
    %1 = vector.load %arg2[%c0_1, %c0_2, %c0_3] : memref<1x16x128xbf16, #tpu.memory_space<vmem>>, vector<1x16x128xbf16>
    %2 = vector.shape_cast %1 : vector<1x16x128xbf16> to vector<16x128xbf16>
    %cst = arith.constant dense<0.000000e+00> : vector<8x128xf32>
    %3 = tpu.matmul %0, %2, %cst {dimension_numbers = #tpu.dot_dimension_numbers<[1], [0], [0], [1], [0, 0, 1, 1], [], []>} : vector<8x16xbf16>, vector<16x128xbf16>, vector<8x128xf32> -> vector<8x128xf32>
    %c0_4 = arith.constant 0 : index
    %c0_5 = arith.constant 0 : index
    %4 = vector.load %arg4[%c0_4, %c0_5] : memref<8x1xf32, #tpu.memory_space<vmem>>, vector<8x1xf32>
    %5 = vector.broadcast %4 : vector<8x1xf32> to vector<8x128xf32>
    %6 = arith.addf %3, %5 : vector<8x128xf32>
    %7 = arith.truncf %6 : vector<8x128xf32> to vector<8x128xbf16>
    %c0_6 = arith.constant 0 : index
    %c0_7 = arith.constant 0 : index
    %c0_8 = arith.constant 0 : index
    %8 = vector.load %arg5[%c0_6, %c0_7, %c0_8] : memref<1x8x128xbf16, #tpu.memory_space<vmem>>, vector<1x8x128xbf16>
    %9 = vector.shape_cast %8 : vector<1x8x128xbf16> to vector<8x128xbf16>
    %10 = vector.shape_cast %7 : vector<8x128xbf16> to vector<1x8x128xbf16>
    tpu.vector_store %arg5[%c0_6, %c0_7, %c0_8], %10 {strides = array<i32>} : memref<1x8x128xbf16, #tpu.memory_space<vmem>>, vector<1x8x128xbf16>,
    return
  }
  func.func @transform_0(%arg0: i32, %arg1: i32) -> (i32, i32, i32) {
    %c0_i32 = arith.constant 0 : i32
    %c0_i32_0 = arith.constant 0 : i32
    %c0_i32_1 = arith.constant 0 : i32
    return %arg0, %c0_i32, %c0_i32_0 : i32, i32, i32
  }
  func.func @transform_1(%arg0: i32, %arg1: i32) -> (i32, i32) {
    %c0_i32 = arith.constant 0 : i32
    %c0_i32_0 = arith.constant 0 : i32
    return %arg1, %c0_i32 : i32, i32
  }
  func.func @transform_2(%arg0: i32, %arg1: i32) -> (i32, i32) {
    %c0_i32 = arith.constant 0 : i32
    %c0_i32_0 = arith.constant 0 : i32
    return %arg1, %c0_i32 : i32, i32
  }
  func.func @transform_3(%arg0: i32, %arg1: i32) -> (i32, i32, i32) {
    %c0_i32 = arith.constant 0 : i32
    %c0_i32_0 = arith.constant 0 : i32
    return %arg0, %arg1, %c0_i32 : i32, i32, i32
  }
}

module attributes {stable_mosaic.version = 11 : i64} {
  func.func @_head_kernel(%arg0: i32, %arg1: memref<1x16x128xbf16, #tpu.memory_space<vmem>>, %arg2: memref<128x256xbf16, #tpu.memory_space<vmem>>, %arg3: memref<1x256xf32, #tpu.memory_space<vmem>>, %arg4: memref<256x2xbf16, #tpu.memory_space<vmem>>, %arg5: memref<1x2xf32, #tpu.memory_space<vmem>>, %arg6: memref<1x1x1xf32, #tpu.memory_space<vmem>>) attributes {dimension_semantics = [#tpu.dimension_semantics<parallel>], iteration_bounds = array<i64: 2>, scalar_prefetch = 0 : i64, scratch_operands = 0 : i64, tpu.core_type = #tpu.core_type<tc>, window_params = [{transform_indices = @transform_0, window_bounds = array<i64: 1, 16, 128>}, {pipeline_mode = #tpu.pipeline_mode<synchronous>, transform_indices = @transform_1, window_bounds = array<i64: 128, 256>}, {pipeline_mode = #tpu.pipeline_mode<synchronous>, transform_indices = @transform_2, window_bounds = array<i64: 1, 256>}, {pipeline_mode = #tpu.pipeline_mode<synchronous>, transform_indices = @transform_3, window_bounds = array<i64: 256, 2>}, {pipeline_mode = #tpu.pipeline_mode<synchronous>, transform_indices = @transform_4, window_bounds = array<i64: 1, 2>}, {transform_indices = @transform_5, window_bounds = array<i64: 1, 1, 1>}]} {
    %c0 = arith.constant 0 : index
    %c0_0 = arith.constant 0 : index
    %c0_1 = arith.constant 0 : index
    %0 = vector.load %arg1[%c0, %c0_0, %c0_1] : memref<1x16x128xbf16, #tpu.memory_space<vmem>>, vector<1x16x128xbf16>
    %1 = vector.shape_cast %0 : vector<1x16x128xbf16> to vector<16x128xbf16>
    %c0_2 = arith.constant 0 : index
    %c0_3 = arith.constant 0 : index
    %2 = vector.load %arg2[%c0_2, %c0_3] : memref<128x256xbf16, #tpu.memory_space<vmem>>, vector<128x256xbf16>
    %cst = arith.constant dense<0.000000e+00> : vector<16x256xf32>
    %3 = tpu.matmul %1, %2, %cst {dimension_numbers = #tpu.dot_dimension_numbers<[1], [0], [0], [1], [0, 0, 1, 1], [], []>} : vector<16x128xbf16>, vector<128x256xbf16>, vector<16x256xf32> -> vector<16x256xf32>
    %c0_4 = arith.constant 0 : index
    %c0_5 = arith.constant 0 : index
    %4 = vector.load %arg3[%c0_4, %c0_5] : memref<1x256xf32, #tpu.memory_space<vmem>>, vector<1x256xf32>
    %5 = vector.broadcast %4 : vector<1x256xf32> to vector<16x256xf32>
    %6 = arith.addf %3, %5 : vector<16x256xf32>
    %cst_6 = arith.constant 0.000000e+00 : f32
    %7 = vector.broadcast %cst_6 : f32 to vector<16x256xf32>
    %8 = arith.maximumf %6, %7 : vector<16x256xf32>
    %9 = arith.truncf %8 : vector<16x256xf32> to vector<16x256xbf16>
    %c0_7 = arith.constant 0 : index
    %c0_8 = arith.constant 0 : index
    %10 = vector.load %arg4[%c0_7, %c0_8] : memref<256x2xbf16, #tpu.memory_space<vmem>>, vector<256x2xbf16>
    %cst_9 = arith.constant dense<0.000000e+00> : vector<16x2xf32>
    %11 = tpu.matmul %9, %10, %cst_9 {dimension_numbers = #tpu.dot_dimension_numbers<[1], [0], [0], [1], [0, 0, 1, 1], [], []>} : vector<16x256xbf16>, vector<256x2xbf16>, vector<16x2xf32> -> vector<16x2xf32>
    %c0_10 = arith.constant 0 : index
    %c0_11 = arith.constant 0 : index
    %12 = vector.load %arg5[%c0_10, %c0_11] : memref<1x2xf32, #tpu.memory_space<vmem>>, vector<1x2xf32>
    %13 = vector.broadcast %12 : vector<1x2xf32> to vector<16x2xf32>
    %14 = arith.addf %11, %13 : vector<16x2xf32>
    %15 = vector.extract_strided_slice %14 {offsets = [0, 0], sizes = [16, 1], strides = [1, 1]} : vector<16x2xf32> to vector<16x1xf32>
    %cst_12 = arith.constant 0.000000e+00 : f32
    %16 = vector.broadcast %cst_12 : f32 to vector<16x1xf32>
    %17 = arith.maximumf %15, %16 : vector<16x1xf32>
    %18 = vector.extract_strided_slice %14 {offsets = [0, 1], sizes = [16, 1], strides = [1, 1]} : vector<16x2xf32> to vector<16x1xf32>
    %19 = arith.negf %18 : vector<16x1xf32>
    %20 = math.exp %19 : vector<16x1xf32>
    %cst_13 = arith.constant 1.000000e+00 : f32
    %21 = vector.broadcast %cst_13 : f32 to vector<16x1xf32>
    %22 = arith.addf %21, %20 : vector<16x1xf32>
    %23 = arith.divf %21, %22 : vector<16x1xf32>
    %24 = arith.mulf %17, %23 : vector<16x1xf32>
    %25 = vector.shape_cast %24 : vector<16x1xf32> to vector<1x16x1xf32>
    %cst_14 = arith.constant dense<0.000000e+00> : vector<1xf32>
    %26 = vector.multi_reduction <add>, %25, %cst_14 [1, 2] : vector<1x16x1xf32> to vector<1xf32>
    %27 = vector.shape_cast %26 : vector<1xf32> to vector<1x1x1xf32>
    %28 = vector.extract %27[0, 0, 0] : f32 from vector<1x1x1xf32>
    %29 = vector.broadcast %28 : f32 to vector<1x1xf32>
    %30 = vector.shape_cast %23 : vector<16x1xf32> to vector<1x16x1xf32>
    %cst_15 = arith.constant dense<0.000000e+00> : vector<1xf32>
    %31 = vector.multi_reduction <add>, %30, %cst_15 [1, 2] : vector<1x16x1xf32> to vector<1xf32>
    %32 = vector.shape_cast %31 : vector<1xf32> to vector<1x1x1xf32>
    %33 = vector.extract %32[0, 0, 0] : f32 from vector<1x1x1xf32>
    %34 = vector.broadcast %33 : f32 to vector<1x1xf32>
    %35 = arith.divf %29, %34 : vector<1x1xf32>
    %c0_16 = arith.constant 0 : index
    %c0_17 = arith.constant 0 : index
    %c0_18 = arith.constant 0 : index
    %36 = vector.load %arg6[%c0_16, %c0_17, %c0_18] : memref<1x1x1xf32, #tpu.memory_space<vmem>>, vector<1x1x1xf32>
    %37 = vector.shape_cast %36 : vector<1x1x1xf32> to vector<1x1xf32>
    %38 = vector.shape_cast %35 : vector<1x1xf32> to vector<1x1x1xf32>
    tpu.vector_store %arg6[%c0_16, %c0_17, %c0_18], %38 {strides = array<i32>} : memref<1x1x1xf32, #tpu.memory_space<vmem>>, vector<1x1x1xf32>,
    return
  }
  func.func @transform_0(%arg0: i32) -> (i32, i32, i32) {
    %c0_i32 = arith.constant 0 : i32
    %c0_i32_0 = arith.constant 0 : i32
    %c0_i32_1 = arith.constant 0 : i32
    return %arg0, %c0_i32, %c0_i32_0 : i32, i32, i32
  }
  func.func @transform_1(%arg0: i32) -> (i32, i32) {
    %c0_i32 = arith.constant 0 : i32
    %c0_i32_0 = arith.constant 0 : i32
    %c0_i32_1 = arith.constant 0 : i32
    return %c0_i32, %c0_i32_0 : i32, i32
  }
  func.func @transform_2(%arg0: i32) -> (i32, i32) {
    %c0_i32 = arith.constant 0 : i32
    %c0_i32_0 = arith.constant 0 : i32
    %c0_i32_1 = arith.constant 0 : i32
    return %c0_i32, %c0_i32_0 : i32, i32
  }
  func.func @transform_3(%arg0: i32) -> (i32, i32) {
    %c0_i32 = arith.constant 0 : i32
    %c0_i32_0 = arith.constant 0 : i32
    %c0_i32_1 = arith.constant 0 : i32
    return %c0_i32, %c0_i32_0 : i32, i32
  }
  func.func @transform_4(%arg0: i32) -> (i32, i32) {
    %c0_i32 = arith.constant 0 : i32
    %c0_i32_0 = arith.constant 0 : i32
    %c0_i32_1 = arith.constant 0 : i32
    return %c0_i32, %c0_i32_0 : i32, i32
  }
  func.func @transform_5(%arg0: i32) -> (i32, i32, i32) {
    %c0_i32 = arith.constant 0 : i32
    %c0_i32_0 = arith.constant 0 : i32
    %c0_i32_1 = arith.constant 0 : i32
    return %arg0, %c0_i32, %c0_i32_0 : i32, i32, i32
  }
}

</mosaic_0001>

<bundles_post_ra>
// kernel: tpu_custom_call.1
= control target key start
LH: loop header
LB: loop body
LE: loop exit
PB: predicated region body
PF: predicated region fallthrough
CT: control target
= control target key end

     0   :  { %6 = vsyncpa [#allocation3], 0  ;;  %s305_s0 = inlined_call_operand.hbm [shape: f32[8,128], index: 0, kind: input, shape index: {}]   ;;  %s306_s1 = inlined_call_operand.hbm [shape: f32[8,128], index: 1, kind: output, shape index: {}]  }
   0x1   :  { %7 = vsyncpa [#allocation4], 0  ;;  %s258_s6 = smov 0  }
   0x2 LB: > { %s145_s7 = sadd.s32 4294967295, %s244_s6   ;;  %p146_p0 = scmp.ge.s32.totalorder %s244_s6, 1  ;;  %s244_s6 = sphi %s258_s6, %s13_s6  }
   0x3   : > { %p60_p1 = scmp.lt.s32.totalorder %s244_s6, 3  ;;  %p270_p3 = scmp.eq.s32.totalorder %s145_s7, 0 }
   0x4   : > { %s246_s10 = smov [#allocation2]  }
   0x5   : > { %p266_p2 = pnand %p146_p0, %p60_p1  ;;  %s73_s11 = sshll.u32 %s246_s10, 4  ;;  %s74_s11 = int_to_ptr.vmem [resolvable:$true] %s73_s11 }
   0x6   : > { %s191_s12 = scalar_lea.vmem %s74_s11, 128  ;;  %p199_p10 = scmp.lt.s32.totalorder %s74_s11, %s74_s11 }
   0x7   : > { %p162_p4 = pneg %p266_p2  ;;  %p192_p7 = scmp.ne.s32.totalorder %s74_s11, %s191_s12 }
   0x8   : > { %p200_p11 = scmp.lt.s32.totalorder %s191_s12, %s191_s12 }
   0x9   : > { %p163_p5 = pnand %p270_p3, %p162_p4 }
   0xa   : > { %p201_p12 = por %p200_p11, %p199_p10 }
   0xb   : > { %p182_p6 = pneg %p163_p5 }
   0xd   : > { %p194_p8 = pnand %p192_p7, %p182_p6 }
   0xf   : > { %p195_p9 = pneg %p194_p8 }
  0x11   : > { %p202_p13 = pnand %p201_p12, %p195_p9 }
  0x13   : > { %205 = shalt.err (!%p202_p13)
}
  0x14   : > { %165 = dma.hbm_to_vmem [thread:$0]  (!%p163_p5), %s305_s0, 128, %s74_s11, [#allocation3]  }
  0x15   : > { %86 = sbr.rel (%p266_p2) target bundleno = 42 (0x2a), region = 24 }
  0x1a   : > { %235 = dma.done.wait (%p270_p3), [#allocation3], 128  }
  0x1b   : > { %237 = vsyncadd (%p270_p3), [#allocation3], 4294967168  ;;  %s247_s15 = smov [#allocation5]   ;;  %v96_v0 = vld [vmem:[#allocation2] sm:$0xff]  ;;  %p287_p0 = scmp.eq.s32.totalorder %s145_s7, 1 }
  0x1c   : > { %s106_s16 = sshll.u32 %s247_s15, 4  ;;  %v97_v1 = vadd.f32 1.0, %v96_v0  ;;  %s107_s16 = int_to_ptr.vmem [resolvable:$true] %s106_s16 }
  0x1d   : > { %s206_s18 = scalar_lea.vmem %s107_s16, 128  ;;  %p213_p5 = scmp.lt.s32.totalorder %s107_s16, %s107_s16 }
  0x1e   : > { %98 = vst [vmem:[#allocation5] sm:$0xff] %v97_v1  ;;  %p207_p1 = scmp.ne.s32.totalorder %s107_s16, %s206_s18  ;;  %p214_p6 = scmp.lt.s32.totalorder %s206_s18, %s206_s18 }
  0x20   : > { %p208_p2 = pnand %p207_p1, %p287_p0  ;;  %p215_p7 = por %p214_p6, %p213_p5 }
  0x22   : > { %p209_p4 = pneg %p208_p2 }
  0x24   : > { %p216_p3 = pnand %p215_p7, %p209_p4 }
  0x26   : > { %219 = shalt.err (!%p216_p3)
}
  0x27   : > { %159 = dma.vmem_to_hbm [thread:$0]  (%p287_p0), %s107_s16, 128, %s306_s1, [#allocation4]  }
  0x28   : > { %239 = dma.done.wait (%p287_p0), [#allocation4], 128  }
  0x29   : > { %241 = vsyncadd (%p287_p0), [#allocation4], 4294967168 }
  0x2a PF: > { %s13_s6 = sadd.s32 1, %s244_s6  }
  0x2b   : > { %p10_p8 = scmp.ge.s32.totalorder %s13_s6, 4  }
  0x2d   :  { %12 = sbr.rel (!%p10_p8) target bundleno = 2 (0x2), region = 53 }
  0x32   :  { %119 = vsyncpa [#allocation3], 1 }
  0x33   :  { %121 = vsyncpa [#allocation3 + $0x1], 1 }
  0x34   :  { %122 = vsyncpa [#allocation4], 1 }
  0x35   :  { %124 = vsyncpa [#allocation4 + $0x1], 1 }

// kernel: maniqa_forward.11
= control target key start
LH: loop header
LB: loop body
LE: loop exit
PB: predicated region body
PF: predicated region fallthrough
CT: control target
= control target key end

     0   :  { %s1280_s21 = smov 0   ;;  %s1282_s22 = smov 0   ;;  %s1463_s0 = inlined_call_operand.vmem [shape: bf16[2,64,128], index: 0, kind: input, shape index: {}]   ;;  %s1464_s1 = inlined_call_operand.vmem [shape: bf16[128,128], index: 1, kind: input, shape index: {}]   ;;  %s1465_s2 = inlined_call_operand.vmem [shape: f32[1,128], index: 2, kind: input, shape index: {}]   ;;  %s1466_s3 = inlined_call_operand.vmem [shape: bf16[128,128], index: 3, kind: input, shape index: {}]   ;;  %s1467_s4 = inlined_call_operand.vmem [shape: f32[128,1], index: 4, kind: input, shape index: {}]   ;;  %s1468_s5 = inlined_call_operand.vmem [shape: bf16[2,64,128], index: 5, kind: output, shape index: {0}]   ;;  %s1469_s6 = inlined_call_operand.vmem [shape: bf16[2,128,64], index: 6, kind: output, shape index: {1}]  }
   0x1   :  { %s1284_s23 = smov 0  }
   0x2 LB: > { %s29_s24 = sadd.s32 1, %s1238_s22  ;;  %p997_p0 = scmp.ge.s32.totalorder %s1242_s23, 1  ;;  %s1242_s23 = sphi %s1284_s23, %s17_s23   ;;  %s1238_s22 = sphi %s1282_s22, %s1471_s22   ;;  %s1234_s21 = sphi %s1280_s21, %s1470_s21  }
   0x3   : > { %p31_p1 = scmp.ge.s32.totalorder %s29_s24, 2  ;;  %p238_p2 = scmp.lt.s32.totalorder %s1242_s23, 3 }
   0x5   : > { %s1473_s24 = smov (%p31_p1, %s29_s24), 0  ;;  %p239_p3 = pnand %p997_p0, %p238_p2 }
   0x6   : > { %p285_p4 = scmp.lt.s32.totalorder (!%p239_p3), %s1234_s21, 1 }
   0x7   : > { %242 = sbr.rel (%p239_p3) target bundleno = 276 (0x114), region = 40 }
   0xc   : > { %v1202_v0 = vld [vmem:[%s1464_s1 + $0x38] sm:$0xff]   ;;  %v1203_v1 = vld [vmem:[%s1464_s1 + $0x30] sm:$0xff]   ;;  %s1475_s21 = smov (!%p285_p4, %s1234_s21), 1  ;;  %v1244_v2 = vmov 0   ;;  %v1205_v3 = vld [vmem:[%s1464_s1 + $0x28] sm:$0xff]   ;;  %vm842_vm0 = vcmask 519168  }
   0xd   : > { %1125 = vmatprep.subr.bf16.mxu0 %v1202_v0  ;;  %1199 = vset.pattern.permute.xlu1 %v1244_v2  ;;  %s1051_s29 = sshll.u32 %s1475_s21, 5  ;;  %v1206_v6 = vld [vmem:[%s1464_s1 + $0x20] sm:$0xff]   ;;  %v1208_v9 = vld [vmem:[%s1464_s1 + $0x18] sm:$0xff]   ;;  %v1209_v11 = vld [vmem:[%s1464_s1 + $0x10] sm:$0xff]   ;;  %s1053_s14 = sshll.u32 %s1475_s21, 6 }
   0xe   : > { %1126 = vmatpush3.bf16.msra.mxu0 %v1202_v0  ;;  %1198 = vset.pattern.permute.xlu0 %v1244_v2  ;;  %s292_s10 = scalar_lea.vmem %s1463_s0, %s1051_s29  ;;  %v1210_v8 = vld [vmem:[%s1466_s3] sm:$0xff]   ;;  %v1212_v12 = vld [vmem:[%s1464_s1 + $0x8] sm:$0xff]   ;;  %v539_v13 = vld [vmem:[%s1467_s4 + $0x10] sm:$0xff]  ;;  %s1411_s17 = scalar_lea.vmem %s1468_s5, %s1051_s29 }
   0xf   : > { %1127 = vmatprep.subr.bf16.mxu0 %v1203_v1  ;;  %v1200_v4 = vld [vmem:[%s292_s10 + $0x18] sm:$0xff]   ;;  %v1201_v5 = vld [vmem:[%s292_s10 + $0x10] sm:$0xff]   ;;  %v1207_v7 = vld [vmem:[%s292_s10] sm:$0xff]   ;;  %1157 = vmatprep.mubr.bf16.mxu1 %v1210_v8  ;;  %s1416_s20 = scalar_lea.vmem %s1469_s6, %s1053_s14 }
  0x10   : > { %1149 = vmatprep.subr.bf16.mxu1 %v1200_v4  ;;  %1141 = vmatprep.mubr.bf16.mxu0 %v1207_v7  ;;  %v1204_v10 = vld [vmem:[%s292_s10 + $0x8] sm:$0xff]   ;;  %v537_v14 = vld [vmem:[%s1467_s4] sm:$0xff]  ;;  %v540_v15 = vld [vmem:[%s1467_s4 + $0x18] sm:$0xff] }
  0x11   : > { %1150 = vmatpush3.bf16.xpose.msra.mxu1 %v1200_v4  ;;  %565 = vperm.xlu1 %1199, %v539_v13   ;;  %v538_v16 = vld [vmem:[%s1467_s4 + $0x8] sm:$0xff]  ;;  %v1213_v17 = vld [vmem:[%s1464_s1] sm:$0xff]   ;;  %v544_v20 = vld [vmem:[%s1467_s4 + $0x38] sm:$0xff] }
  0x12   : > { %1128 = vmatpush3.bf16.msra.mxu0 %v1203_v1  ;;  %1151 = vmatprep.subr.bf16.mxu1 %v1201_v5  ;;  %v542_v18 = vld [vmem:[%s1467_s4 + $0x28] sm:$0xff]  ;;  %v541_v19 = vld [vmem:[%s1467_s4 + $0x20] sm:$0xff]  ;;  %v543_v21 = vld [vmem:[%s1467_s4 + $0x30] sm:$0xff] }
  0x13   : > { %1129 = vmatprep.subr.bf16.mxu0 %v1205_v3  ;;  %555 = vperm.xlu0 %1198, %v537_v14   ;;  %v546_v22 = vld [vmem:[%s1467_s4 + $0x48] sm:$0xff]  ;;  %v545_v23 = vld [vmem:[%s1467_s4 + $0x40] sm:$0xff]  ;;  %v1214_v25 = vld [vmem:[%s1466_s3 + $0x10] sm:$0xff]  }
  0x14   : > { %v1211_v24 = vld [vmem:[%s1466_s3 + $0x8] sm:$0xff]   ;;  %v548_v26 = vld [vmem:[%s1467_s4 + $0x58] sm:$0xff]  ;;  %v547_v27 = vld [vmem:[%s1467_s4 + $0x50] sm:$0xff] }
  0x15   : > { %570 = vperm.xlu1 %1199, %v540_v15   ;;  %v550_v28 = vld [vmem:[%s1467_s4 + $0x68] sm:$0xff]  ;;  %v549_v29 = vld [vmem:[%s1467_s4 + $0x60] sm:$0xff]  ;;  %v1215_v30 = vld [vmem:[%s1466_s3 + $0x18] sm:$0xff]  }
  0x16   : > { %1130 = vmatpush3.bf16.msra.mxu0 %v1205_v3  ;;  %v1216_v31 = vld [vmem:[%s1466_s3 + $0x20] sm:$0xff]   ;;  %v552_v32 = vld [vmem:[%s1467_s4 + $0x78] sm:$0xff]  ;;  %v551_v33 = vld [vmem:[%s1467_s4 + $0x70] sm:$0xff] }
  0x17   : > { %1131 = vmatprep.subr.bf16.mxu0 %v1206_v6  ;;  %560 = vperm.xlu0 %1198, %v538_v16   ;;  %v1217_v34 = vld [vmem:[%s1466_s3 + $0x28] sm:$0xff]   ;;  %v1218_v35 = vld [vmem:[%s1466_s3 + $0x30] sm:$0xff]   ;;  %v1219_v36 = vld [vmem:[%s1466_s3 + $0x38] sm:$0xff]  }
  0x18   : > { %v1004_v43 = vld [vmem:[%s1465_s2] ss:$0 sm:$0xff] }
  0x19   : > { %1152 = vmatpush3.bf16.xpose.msra.mxu1 %v1201_v5  ;;  %580 = vperm.xlu1 %1199, %v542_v18  }
  0x1a   : > { %1132 = vmatpush3.bf16.msra.mxu0 %v1206_v6  ;;  %1153 = vmatprep.subr.bf16.mxu1 %v1204_v10 }
  0x1b   : > { %1133 = vmatprep.subr.bf16.mxu0 %v1208_v9  ;;  %575 = vperm.xlu0 %1198, %v541_v19  }
  0x1d   : > { %590 = vperm.xlu1 %1199, %v544_v20  }
  0x1e   : > { %1134 = vmatpush3.bf16.msra.mxu0 %v1208_v9 }
  0x1f   : > { %1135 = vmatprep.subr.bf16.mxu0 %v1209_v11  ;;  %585 = vperm.xlu0 %1198, %v543_v21  }
  0x21   : > { %1154 = vmatpush3.bf16.xpose.msra.mxu1 %v1204_v10  ;;  %600 = vperm.xlu1 %1199, %v546_v22  }
  0x22   : > { %1136 = vmatpush3.bf16.msra.mxu0 %v1209_v11  ;;  %1155 = vmatprep.subr.bf16.mxu1 %v1207_v7 }
  0x23   : > { %1137 = vmatprep.subr.bf16.mxu0 %v1212_v12  ;;  %595 = vperm.xlu0 %1198, %v545_v23  }
  0x25   : > { %610 = vperm.xlu1 %1199, %v548_v26  }
  0x26   : > { %1138 = vmatpush3.bf16.msra.mxu0 %v1212_v12 }
  0x27   : > { %1139 = vmatprep.subr.bf16.mxu0 %v1213_v17  ;;  %605 = vperm.xlu0 %1198, %v547_v27  }
  0x29   : > { %1156 = vmatpush3.bf16.xpose.msra.mxu1 %v1207_v7  ;;  %620 = vperm.xlu1 %1199, %v550_v28  }
  0x2a   : > { %1140 = vmatpush3.bf16.msra.mxu0 %v1213_v17 }
  0x2b   : > { %615 = vperm.xlu0 %1198, %v549_v29  }
  0x2d   : > { %1142 = vmatmul.mubr.bf16.vlgmr.msra.gmra.mxu0 %v1204_v10  ;;  %630 = vperm.xlu1 %1199, %v552_v32  }
  0x2e   : > { %1145 = vmatprep.mubr.bf16.mxu0 %v1201_v5 }
  0x2f   : > { %625 = vperm.xlu0 %1198, %v551_v33  }
  0x30   : > { %1158 = vmatmul.mubr.bf16.vlgmr.msra.gmra.mxu1 %v1211_v24 }
  0x31   : > { %1161 = vmatprep.mubr.bf16.mxu1 %v1214_v25 }
  0x35   : > { %1146 = vmatmul.mubr.bf16.gmra.mxu0 %v1200_v4 }
  0x38   : > { %1162 = vmatmul.mubr.bf16.gmra.mxu1 %v1215_v30 }
  0x39   : > { %1165 = vmatprep.mubr.bf16.mxu1 %v1216_v31 }
  0x40   : > { %1166 = vmatmul.mubr.bf16.gmra.mxu1 %v1217_v34 }
  0x41   : > { %1169 = vmatprep.mubr.bf16.mxu1 %v1218_v35 }
  0x48   : > { %1170 = vmatmul.mubr.bf16.gmra.mxu1 %v1219_v36 }
  0x8c   : > { %v566_v38 = vpop.permute.xlu1 %565 }
  0x8e   : > { %v556_v37 = vpop.permute.xlu0 %555 }
  0x90   : > { %v571_v40 = vpop.permute.xlu1 %570 }
  0x92   : > { %v561_v39 = vpop.permute.xlu0 %560 }
  0x94   : > { %v581_v45 = vpop.permute.xlu1 %580 }
  0x96   : > { %v576_v41 = vpop.permute.xlu0 %575 }
  0x98   : > { %v591_v58 = vpop.permute.xlu1 %590 }
  0x9a   : > { %v586_v48 = vpop.permute.xlu0 %585 }
  0x9c   : > { %v601_v16 = vpop.permute.xlu1 %600 }
  0x9e   : > { %v596_v0 = vpop.permute.xlu0 %595 }
  0xa0   : > { %v611_v28 = vpop.permute.xlu1 %610 }
  0xa2   : > { %v606_v21 = vpop.permute.xlu0 %605 }
  0xa6   : > { %v616_v32 = vpop.permute.xlu0 %615 }
  0xed   : > { %v1143_v42 = vpop.f32.mrf.mxu0 }
  0xee   : > { %v459_v46 = vadd.f32 %v1143_v42, %v1004_v43 }
  0xef   : > { %v450_v44 = vpop.f32.mrf.mxu0 }
  0xf0   : > { %v451_v49 = vadd.f32 %v1004_v43, %v450_v44  ;;  %v1159_v51 = vpop.f32.mrf.mxu1 }
  0xf1   : > { %v1144_v47 = vpop.f32.mrf.mxu0  ;;  %v724_v53 = vadd.f32 %v1159_v51, %v566_v38 }
  0xf2   : > { %v462_v50 = vadd.f32 %v1144_v47, %v1004_v43  ;;  %v715_v56 = vpop.f32.mrf.mxu1 }
  0xf3   : > { %v453_v52 = vpop.f32.mrf.mxu0  ;;  %v1064_v59 = vpack.c.bf16 %v724_v53, %v724_v53  ;;  %v716_v60 = vadd.f32 %v715_v56, %v556_v37 }
  0xf4   : > { %v1086_v54 = vpack.c.bf16 %v462_v50, %v459_v46  ;;  %v454_v55 = vadd.f32 %v1004_v43, %v453_v52  ;;  %v1160_v62 = vpop.f32.mrf.mxu1 }
  0xf5   : > { %v1147_v57 = vpop.f32.mrf.mxu0  ;;  %845 = vst.msk [vmem:[%s1416_s20 + $0x8] sm:$0xf] %vm842_vm0, %v1064_v59  ;;  %v1062_v1 = vpack.c.bf16 %v716_v60, %v716_v60  ;;  %v727_v2 = vadd.f32 %v1160_v62, %v571_v40 }
  0xf6   : > { %1098 = vst [vmem:[%s1411_s17 + $0x8] sm:$0xff] %v1086_v54   ;;  %v1081_v61 = vpack.c.bf16 %v454_v55, %v451_v49  ;;  %v475_v3 = vadd.f32 %v1147_v57, %v1004_v43  ;;  %v718_v4 = vpop.f32.mrf.mxu1 }
  0xf7   : > { %v466_v63 = vpop.f32.mrf.mxu0  ;;  %843 = vst.msk [vmem:[%s1416_s20] sm:$0xf] %vm842_vm0, %v1062_v1  ;;  %v1065_v6 = vpack.c.bf16 %v727_v2, %v727_v2  ;;  %v719_v7 = vadd.f32 %v718_v4, %v561_v39  ;;  %v621_v39 = vpop.permute.xlu1 %620 }
  0xf8   : > { %1082 = vst [vmem:[%s1411_s17] sm:$0xff] %v1081_v61   ;;  %v467_v8 = vadd.f32 %v1004_v43, %v466_v63  ;;  %v1163_v10 = vpop.f32.mrf.mxu1 }
  0xf9   : > { %v1148_v5 = vpop.f32.mrf.mxu0  ;;  %846 = vst.msk [vmem:[%s1416_s20 + $0xc] sm:$0xf] %vm842_vm0, %v1065_v6  ;;  %v1063_v12 = vpack.c.bf16 %v719_v7, %v719_v7  ;;  %v740_v13 = vadd.f32 %v1163_v10, %v586_v48 }
  0xfa   : > { %v478_v9 = vadd.f32 %v1148_v5, %v1004_v43  ;;  %v731_v17 = vpop.f32.mrf.mxu1 }
  0xfb   : > { %v469_v11 = vpop.f32.mrf.mxu0  ;;  %844 = vst.msk [vmem:[%s1416_s20 + $0x4] sm:$0xf] %vm842_vm0, %v1063_v12  ;;  %v1068_v18 = vpack.c.bf16 %v740_v13, %v740_v13  ;;  %v732_v19 = vadd.f32 %v731_v17, %v576_v41  ;;  %v631_v50 = vpop.permute.xlu1 %630 }
  0xfc   : > { %v1096_v14 = vpack.c.bf16 %v478_v9, %v475_v3  ;;  %v470_v15 = vadd.f32 %v1004_v43, %v469_v11  ;;  %v1164_v22 = vpop.f32.mrf.mxu1  ;;  %v626_v43 = vpop.permute.xlu0 %625 }
  0xfd   : > { %849 = vst.msk [vmem:[%s1416_s20 + $0x18] sm:$0xf] %vm842_vm0, %v1068_v18  ;;  %v1066_v23 = vpack.c.bf16 %v732_v19, %v732_v19  ;;  %v743_v24 = vadd.f32 %v1164_v22, %v591_v58 }
  0xfe   : > { %1100 = vst [vmem:[%s1411_s17 + $0x18] sm:$0xff] %v1096_v14   ;;  %v1091_v20 = vpack.c.bf16 %v470_v15, %v467_v8  ;;  %v734_v25 = vpop.f32.mrf.mxu1 }
  0xff   : > { %847 = vst.msk [vmem:[%s1416_s20 + $0x10] sm:$0xf] %vm842_vm0, %v1066_v23  ;;  %v1069_v26 = vpack.c.bf16 %v743_v24, %v743_v24  ;;  %v735_v27 = vadd.f32 %v734_v25, %v581_v45 }
 0x100   : > { %1099 = vst [vmem:[%s1411_s17 + $0x10] sm:$0xff] %v1091_v20   ;;  %v1167_v29 = vpop.f32.mrf.mxu1 }
 0x101   : > { %850 = vst.msk [vmem:[%s1416_s20 + $0x1c] sm:$0xf] %vm842_vm0, %v1069_v26  ;;  %v1067_v30 = vpack.c.bf16 %v735_v27, %v735_v27  ;;  %v756_v31 = vadd.f32 %v1167_v29, %v606_v21 }
 0x102   : > { %v747_v33 = vpop.f32.mrf.mxu1 }
 0x103   : > { %848 = vst.msk [vmem:[%s1416_s20 + $0x14] sm:$0xf] %vm842_vm0, %v1067_v30  ;;  %v1072_v34 = vpack.c.bf16 %v756_v31, %v756_v31  ;;  %v748_v35 = vadd.f32 %v747_v33, %v596_v0 }
 0x104   : > { %v1168_v36 = vpop.f32.mrf.mxu1 }
 0x105   : > { %853 = vst.msk [vmem:[%s1416_s20 + $0x28] sm:$0xf] %vm842_vm0, %v1072_v34  ;;  %v1070_v37 = vpack.c.bf16 %v748_v35, %v748_v35  ;;  %v759_v38 = vadd.f32 %v1168_v36, %v611_v28 }
 0x106   : > { %v750_v40 = vpop.f32.mrf.mxu1 }
 0x107   : > { %851 = vst.msk [vmem:[%s1416_s20 + $0x20] sm:$0xf] %vm842_vm0, %v1070_v37  ;;  %v1073_v41 = vpack.c.bf16 %v759_v38, %v759_v38  ;;  %v751_v42 = vadd.f32 %v750_v40, %v601_v16 }
 0x108   : > { %v1171_v44 = vpop.f32.mrf.mxu1 }
 0x109   : > { %854 = vst.msk [vmem:[%s1416_s20 + $0x2c] sm:$0xf] %vm842_vm0, %v1073_v41  ;;  %v1071_v45 = vpack.c.bf16 %v751_v42, %v751_v42  ;;  %v772_v46 = vadd.f32 %v1171_v44, %v626_v43 }
 0x10a   : > { %v763_v47 = vpop.f32.mrf.mxu1 }
 0x10b   : > { %852 = vst.msk [vmem:[%s1416_s20 + $0x24] sm:$0xf] %vm842_vm0, %v1071_v45  ;;  %v1076_v48 = vpack.c.bf16 %v772_v46, %v772_v46  ;;  %v764_v49 = vadd.f32 %v763_v47, %v616_v32 }
 0x10c   : > { %v1172_v51 = vpop.f32.mrf.mxu1 }
 0x10d   : > { %857 = vst.msk [vmem:[%s1416_s20 + $0x38] sm:$0xf] %vm842_vm0, %v1076_v48  ;;  %v1074_v52 = vpack.c.bf16 %v764_v49, %v764_v49  ;;  %v775_v53 = vadd.f32 %v1172_v51, %v631_v50 }
 0x10e   : > { %v766_v54 = vpop.f32.mrf.mxu1 }
 0x10f   : > { %855 = vst.msk [vmem:[%s1416_s20 + $0x30] sm:$0xf] %vm842_vm0, %v1074_v52  ;;  %v1077_v55 = vpack.c.bf16 %v775_v53, %v775_v53  ;;  %v767_v56 = vadd.f32 %v766_v54, %v621_v39 }
 0x111   : > { %858 = vst.msk [vmem:[%s1416_s20 + $0x3c] sm:$0xf] %vm842_vm0, %v1077_v55  ;;  %v1075_v57 = vpack.c.bf16 %v767_v56, %v767_v56 }
 0x113   : > { %856 = vst.msk [vmem:[%s1416_s20 + $0x34] sm:$0xf] %vm842_vm0, %v1075_v57 }
 0x114 PF: > { %s17_s23 = sadd.s32 1, %s1242_s23   ;;  %s1470_s21 = smov %s1238_s22 }
 0x115   : > { %p14_p5 = scmp.ge.s32.totalorder %s17_s23, 4   ;;  %s1471_s22 = smov %s1473_s24 }
 0x117   :  { %16 = sbr.rel (!%p14_p5) target bundleno = 2 (0x2), region = 82 }

// kernel: maniqa_forward.12
= control target key start
LH: loop header
LB: loop body
LE: loop exit
PB: predicated region body
PF: predicated region fallthrough
CT: control target
= control target key end

     0   :  { %s1359_s18 = smov 0   ;;  %s1361_s19 = smov 0   ;;  %s1521_s0 = inlined_call_operand.vmem [shape: bf16[2,64,128], index: 0, kind: input, shape index: {}]   ;;  %s1522_s1 = inlined_call_operand.vmem [shape: bf16[128,128], index: 1, kind: input, shape index: {}]   ;;  %s1523_s2 = inlined_call_operand.vmem [shape: f32[1,128], index: 2, kind: input, shape index: {}]   ;;  %s1524_s3 = inlined_call_operand.vmem [shape: bf16[2,64,128], index: 3, kind: input, shape index: {}]   ;;  %s1525_s4 = inlined_call_operand.vmem [shape: bf16[2,128,64], index: 4, kind: input, shape index: {}]   ;;  %s1526_s5 = inlined_call_operand.vmem [shape: bf16[2,128,64], index: 5, kind: output, shape index: {}]  }
   0x1   :  { %s1363_s20 = smov 0  }
   0x2 LB: > { %s27_s21 = sadd.s32 1, %s1323_s19  ;;  %p1045_p0 = scmp.ge.s32.totalorder %s1327_s20, 1  ;;  %s1327_s20 = sphi %s1363_s20, %s15_s20   ;;  %s1323_s19 = sphi %s1361_s19, %s1528_s19   ;;  %s1319_s18 = sphi %s1359_s18, %s1527_s18  }
   0x3   : > { %p29_p1 = scmp.ge.s32.totalorder %s27_s21, 2  ;;  %p228_p2 = scmp.lt.s32.totalorder %s1327_s20, 3 }
   0x5   : > { %s1530_s21 = smov (%p29_p1, %s27_s21), 0  ;;  %p229_p3 = pnand %p1045_p0, %p228_p2 }
   0x6   : > { %p274_p4 = scmp.lt.s32.totalorder (!%p229_p3), %s1319_s18, 1 }
   0x7   : > { %232 = sbr.rel (%p229_p3) target bundleno = 1026 (0x402), region = 40 }
   0xc   : > { %v1249_v0 = vld [vmem:[%s1522_s1 + $0x38] sm:$0xff]   ;;  %v1250_v1 = vld [vmem:[%s1522_s1 + $0x30] sm:$0xff]   ;;  %s1532_s18 = smov (!%p274_p4, %s1319_s18), 1  ;;  %v1251_v2 = vld [vmem:[%s1522_s1 + $0x28] sm:$0xff]   ;;  %vm571_vm0 = vcmask 523264   ;;  %vm917_vm1 = vcmask 519168  }
   0xd   : > { %1157 = vmatprep.subr.bf16.mxu1 %v1249_v0  ;;  %s1105_s28 = sshll.u32 %s1532_s18, 5  ;;  %v1252_v3 = vld [vmem:[%s1522_s1 + $0x20] sm:$0xff]   ;;  %s1107_s12 = sshll.u32 %s1532_s18, 6  ;;  %v1253_v5 = vld [vmem:[%s1522_s1 + $0x18] sm:$0xff]   ;;  %v1254_v6 = vld [vmem:[%s1522_s1 + $0x10] sm:$0xff]  }
   0xe   : > { %1158 = vmatpush3.bf16.msra.mxu1 %v1249_v0  ;;  %s1392_s6 = scalar_lea.vmem %s1521_s0, %s1105_s28  ;;  %s1401_s11 = scalar_lea.vmem %s1524_s3, %s1105_s28  ;;  %v1255_v7 = vld [vmem:[%s1522_s1 + $0x8] sm:$0xff]   ;;  %v1256_v8 = vld [vmem:[%s1522_s1] sm:$0xff]  }
   0xf   : > { %1159 = vmatprep.subr.bf16.mxu1 %v1250_v1  ;;  %v1257_v4 = vld [vmem:[%s1392_s6] sm:$0xff]   ;;  %s1415_s23 = scalar_lea.vmem %s1525_s4, %s1107_s12  ;;  %v1261_v9 = vld [vmem:[%s1401_s11 + $0x18] sm:$0xff]   ;;  %v1258_v10 = vld [vmem:[%s1392_s6 + $0x8] sm:$0xff]   ;;  %s1478_s7 = scalar_lea.vmem %s1526_s5, %s1107_s12 }
  0x10   : > { %1173 = vmatprep.mubr.bf16.mxu1 %v1257_v4  ;;  %v1259_v11 = vld [vmem:[%s1392_s6 + $0x10] sm:$0xff]   ;;  %v1260_v13 = vld [vmem:[%s1392_s6 + $0x18] sm:$0xff]   ;;  %v1263_v14 = vld [vmem:[%s1401_s11 + $0x8] sm:$0xff]  }
  0x11   : > { %v1262_v12 = vld [vmem:[%s1401_s11 + $0x10] sm:$0xff]   ;;  %v1264_v15 = vld [vmem:[%s1401_s11] sm:$0xff]  }
  0x12   : > { %1160 = vmatpush3.bf16.msra.mxu1 %v1250_v1  ;;  %v1054_v19 = vld [vmem:[%s1523_s2] ss:$0 sm:$0xff] }
  0x13   : > { %1161 = vmatprep.subr.bf16.mxu1 %v1251_v2 }
  0x16   : > { %1162 = vmatpush3.bf16.msra.mxu1 %v1251_v2 }
  0x17   : > { %1163 = vmatprep.subr.bf16.mxu1 %v1252_v3 }
  0x1a   : > { %1164 = vmatpush3.bf16.msra.mxu1 %v1252_v3 }
  0x1b   : > { %1165 = vmatprep.subr.bf16.mxu1 %v1253_v5 }
  0x1e   : > { %1166 = vmatpush3.bf16.msra.mxu1 %v1253_v5 }
  0x1f   : > { %1167 = vmatprep.subr.bf16.mxu1 %v1254_v6 }
  0x22   : > { %1168 = vmatpush3.bf16.msra.mxu1 %v1254_v6 }
  0x23   : > { %1169 = vmatprep.subr.bf16.mxu1 %v1255_v7 }
  0x26   : > { %1170 = vmatpush3.bf16.msra.mxu1 %v1255_v7 }
  0x27   : > { %1171 = vmatprep.subr.bf16.mxu1 %v1256_v8 }
  0x2a   : > { %1172 = vmatpush3.bf16.msra.mxu1 %v1256_v8 }
  0x2b   : > { %1181 = vmatprep.subr.bf16.mxu1 %v1261_v9 }
  0x2d   : > { %1174 = vmatmul.mubr.bf16.vlgmr.msra.gmra.mxu1 %v1258_v10 }
  0x2e   : > { %1177 = vmatprep.mubr.bf16.mxu1 %v1259_v11  ;;  %1182 = vmatpush3.bf16.xpose.msra.mxu1 %v1261_v9 }
  0x2f   : > { %1183 = vmatprep.subr.bf16.mxu1 %v1262_v12 }
  0x35   : > { %1178 = vmatmul.mubr.bf16.gmra.mxu1 %v1260_v13 }
  0x36   : > { %1184 = vmatpush3.bf16.xpose.msra.mxu1 %v1262_v12 }
  0x37   : > { %1185 = vmatprep.subr.bf16.mxu1 %v1263_v14 }
  0x3e   : > { %1186 = vmatpush3.bf16.xpose.msra.mxu1 %v1263_v14 }
  0x3f   : > { %1187 = vmatprep.subr.bf16.mxu1 %v1264_v15 }
  0x46   : > { %1188 = vmatpush3.bf16.xpose.msra.mxu1 %v1264_v15 }
  0xed   : > { %v1175_v16 = vpop.f32.mrf.mxu1 }
  0xee   : > { %v448_v24 = vadd.f32 %v1175_v16, %v1054_v19 }
  0xef   : > { %v439_v17 = vpop.f32.mrf.mxu1 }
  0xf0   : > { %v440_v22 = vadd.f32 %v1054_v19, %v439_v17 }
  0xf1   : > { %v1176_v18 = vpop.f32.mrf.mxu1 }
  0xf2   : > { %v451_v20 = vadd.f32 %v1176_v18, %v1054_v19 }
  0xf3   : > { %v442_v21 = vpop.f32.mrf.mxu1 }
  0xf4   : > { %v443_v23 = vadd.f32 %v1054_v19, %v442_v21  ;;  %v471_v27 = vpack.c.bf16 %v451_v20, %v448_v24 }
  0xf5   : > { %v1179_v25 = vpop.f32.mrf.mxu1 }
  0xf6   : > { %v470_v26 = vpack.c.bf16 %v443_v23, %v440_v22  ;;  %v464_v34 = vadd.f32 %v1179_v25, %v1054_v19 }
  0xf7   : > { %v455_v28 = vpop.f32.mrf.mxu1 }
  0xf8   : > { %1189 = vmatprep.mubr.bf16.mxu1 %v470_v26  ;;  %v456_v32 = vadd.f32 %v1054_v19, %v455_v28 }
  0xf9   : > { %v1180_v29 = vpop.f32.mrf.mxu1  ;;  %1190 = vmatmul.mubr.bf16.vlgmr.msra.gmra.mxu1 %v471_v27 }
  0xfa   : > { %v467_v30 = vadd.f32 %v1180_v29, %v1054_v19  ;;  %v1265_v29 = vld [vmem:[%s1415_s23] sm:$0xff]  }
  0xfb   : > { %v458_v31 = vpop.f32.mrf.mxu1  ;;  %1205 = vmatprep.mubr.msk.bf16.mxu0 %vm571_vm0, %v1265_v29 }
  0xfc   : > { %v459_v33 = vadd.f32 %v1054_v19, %v458_v31  ;;  %v473_v36 = vpack.c.bf16 %v467_v30, %v464_v34 }
  0xfe   : > { %v472_v35 = vpack.c.bf16 %v459_v33, %v456_v32 }
 0x100   : > { %1193 = vmatprep.mubr.bf16.mxu1 %v472_v35 }
 0x101   : > { %1194 = vmatmul.mubr.bf16.gmra.mxu1 %v473_v36 }
 0x1b9   : > { %v1191_v37 = vpop.f32.mrf.mxu1 }
 0x1ba   : > { %v578_v49 = vsel %vm571_vm0, %v1191_v37, -inf }
 0x1bb   : > { %v540_v38 = vpop.f32.mrf.mxu1 }
 0x1bc   : > { %v572_v51 = vsel %vm571_vm0, %v540_v38, -inf }
 0x1bd   : > { %v1192_v39 = vpop.f32.mrf.mxu1 }
 0x1be   : > { %v581_v50 = vsel %vm571_vm0, %v1192_v39, -inf }
 0x1bf   : > { %v543_v40 = vpop.f32.mrf.mxu1 }
 0x1c0   : > { %v575_v52 = vsel %vm571_vm0, %v543_v40, -inf }
 0x1c1   : > { %v1195_v41 = vpop.f32.mrf.mxu1 }
 0x1c2   : > { %v590_v42 = vsel %vm571_vm0, %v1195_v41, -inf }
 0x1c3   : > { %591 = vmax.xlane.f32.xlu0 %v590_v42  ;;  %v556_v43 = vpop.f32.mrf.mxu1 }
 0x1c4   : > { %v584_v44 = vsel %vm571_vm0, %v556_v43, -inf }
 0x1c5   : > { %585 = vmax.xlane.f32.xlu1 %v584_v44  ;;  %v1196_v45 = vpop.f32.mrf.mxu1 }
 0x1c6   : > { %v593_v46 = vsel %vm571_vm0, %v1196_v45, -inf }
 0x1c7   : > { %594 = vmax.xlane.f32.xlu0 %v593_v46  ;;  %v559_v47 = vpop.f32.mrf.mxu1 }
 0x1c8   : > { %v587_v48 = vsel %vm571_vm0, %v559_v47, -inf }
 0x1c9   : > { %588 = vmax.xlane.f32.xlu1 %v587_v48 }
 0x1cb   : > { %579 = vmax.xlane.f32.xlu0 %v578_v49 }
 0x1cd   : > { %582 = vmax.xlane.f32.xlu1 %v581_v50 }
 0x1cf   : > { %573 = vmax.xlane.f32.xlu0 %v572_v51 }
 0x1d1   : > { %576 = vmax.xlane.f32.xlu1 %v575_v52 }
 0x24c   : > { %v592_v53 = vpop.xlane.xlu0 %591 }
 0x24d   : > { %v602_v54 = vsub.f32 %v1195_v41, %v592_v53 }
 0x24e   : > { %v586_v55 = vpop.xlane.xlu1 %585 }
 0x24f   : > { %v616_v56 = vmul.f32 1.442695, %v602_v54  ;;  %v600_v57 = vsub.f32 %v556_v43, %v586_v55 }
 0x250   : > { %v595_v58 = vpop.xlane.xlu0 %594 }
 0x251   : > { %1273 = vpow2.f32 %v616_v56  ;;  %v612_v59 = vmul.f32 1.442695, %v600_v57  ;;  %v603_v60 = vsub.f32 %v1196_v45, %v595_v58 }
 0x252   : > { %v589_v61 = vpop.xlane.xlu1 %588 }
 0x253   : > { %1275 = vpow2.f32 %v612_v59  ;;  %v618_v62 = vmul.f32 1.442695, %v603_v60  ;;  %v601_v63 = vsub.f32 %v559_v47, %v589_v61 }
 0x254   : > { %v580_v0 = vpop.xlane.xlu0 %579 }
 0x255   : > { %1277 = vpow2.f32 %v618_v62  ;;  %v614_v1 = vmul.f32 1.442695, %v601_v63  ;;  %v598_v2 = vsub.f32 %v1191_v37, %v580_v0  ;;  %v1266_v62 = vld [vmem:[%s1415_s23 + $0x8] sm:$0xff]   ;;  %v1267_v63 = vld [vmem:[%s1415_s23 + $0x10] sm:$0xff]   ;;  %v1268_v0 = vld [vmem:[%s1415_s23 + $0x18] sm:$0xff]  }
 0x256   : > { %v583_v3 = vpop.xlane.xlu1 %582 }
 0x257   : > { %1279 = vpow2.f32 %v614_v1  ;;  %v608_v4 = vmul.f32 1.442695, %v598_v2  ;;  %v599_v5 = vsub.f32 %v1192_v39, %v583_v3  ;;  %v1269_v1 = vld [vmem:[%s1415_s23 + $0x20] sm:$0xff]   ;;  %v1270_v2 = vld [vmem:[%s1415_s23 + $0x28] sm:$0xff]   ;;  %v1271_v3 = vld [vmem:[%s1415_s23 + $0x30] sm:$0xff]  }
 0x258   : > { %v574_v6 = vpop.xlane.xlu0 %573 }
 0x259   : > { %1281 = vpow2.f32 %v608_v4  ;;  %v610_v7 = vmul.f32 1.442695, %v599_v5  ;;  %v596_v8 = vsub.f32 %v540_v38, %v574_v6  ;;  %v1272_v4 = vld [vmem:[%s1415_s23 + $0x38] sm:$0xff]  }
 0x25a   : > { %v577_v9 = vpop.xlane.xlu1 %576 }
 0x25b   : > { %1283 = vpow2.f32 %v610_v7  ;;  %v604_v10 = vmul.f32 1.442695, %v596_v8  ;;  %v597_v11 = vsub.f32 %v543_v40, %v577_v9 }
 0x25d   : > { %1285 = vpow2.f32 %v604_v10  ;;  %v606_v12 = vmul.f32 1.442695, %v597_v11 }
 0x25e   : > { %v1274_v13 = vpop.eup %1273 }
 0x25f   : > { %1287 = vpow2.f32 %v606_v12  ;;  %v638_v14 = vsel %vm571_vm0, %v1274_v13, 0.0 }
 0x260   : > { %v1276_v15 = vpop.eup %1275  ;;  %639 = vadd.xlane.f32.xlu0 %v638_v14 }
 0x261   : > { %v632_v17 = vsel %vm571_vm0, %v1276_v15, 0.0 }
 0x262   : > { %v1278_v16 = vpop.eup %1277 }
 0x263   : > { %v641_v18 = vsel %vm571_vm0, %v1278_v16, 0.0 }
 0x264   : > { %v1280_v19 = vpop.eup %1279  ;;  %633 = vadd.xlane.f32.xlu0 %v632_v17  ;;  %642 = vadd.xlane.f32.xlu1 %v641_v18 }
 0x265   : > { %v635_v22 = vsel %vm571_vm0, %v1280_v19, 0.0 }
 0x266   : > { %v1282_v20 = vpop.eup %1281 }
 0x267   : > { %v626_v21 = vsel %vm571_vm0, %v1282_v20, 0.0 }
 0x268   : > { %v1284_v23 = vpop.eup %1283  ;;  %627 = vadd.xlane.f32.xlu0 %v626_v21  ;;  %636 = vadd.xlane.f32.xlu1 %v635_v22 }
 0x269   : > { %v629_v26 = vsel %vm571_vm0, %v1284_v23, 0.0 }
 0x26a   : > { %v1286_v24 = vpop.eup %1285 }
 0x26b   : > { %v620_v25 = vsel %vm571_vm0, %v1286_v24, 0.0 }
 0x26c   : > { %v1288_v27 = vpop.eup %1287  ;;  %621 = vadd.xlane.f32.xlu0 %v620_v25  ;;  %630 = vadd.xlane.f32.xlu1 %v629_v26 }
 0x26d   : > { %v623_v28 = vsel %vm571_vm0, %v1288_v27, 0.0 }
 0x270   : > { %624 = vadd.xlane.f32.xlu1 %v623_v28 }
 0x2e9   : > { %v640_v30 = vpop.xlane.xlu0 %639 }
 0x2ea   : > { %1289 = vrcp.f32 %v640_v30 }
 0x2ed   : > { %v634_v31 = vpop.xlane.xlu0 %633  ;;  %v643_v32 = vpop.xlane.xlu1 %642 }
 0x2ee   : > { %1291 = vrcp.f32 %v643_v32 }
 0x2ef   : > { %1293 = vrcp.f32 %v634_v31 }
 0x2f1   : > { %v637_v33 = vpop.xlane.xlu1 %636  ;;  %v628_v34 = vpop.xlane.xlu0 %627 }
 0x2f2   : > { %1295 = vrcp.f32 %v637_v33 }
 0x2f3   : > { %1297 = vrcp.f32 %v628_v34 }
 0x2f5   : > { %v631_v35 = vpop.xlane.xlu1 %630  ;;  %v622_v39 = vpop.xlane.xlu0 %621 }
 0x2f6   : > { %1299 = vrcp.f32 %v631_v35 }
 0x2f7   : > { %v1290_v36 = vpop.eup %1289 }
 0x2f8   : > { %v658_v40 = vmul.f32 %v1290_v36, %v1274_v13 }
 0x2f9   : > { %v625_v37 = vpop.xlane.xlu1 %624 }
 0x2fa   : > { %1301 = vrcp.f32 %v625_v37 }
 0x2fb   : > { %v1292_v38 = vpop.eup %1291  ;;  %1303 = vrcp.f32 %v622_v39 }
 0x2fc   : > { %v659_v41 = vmul.f32 %v1292_v38, %v1278_v16  ;;  %v1294_v42 = vpop.eup %1293 }
 0x2fd   : > { %v656_v46 = vmul.f32 %v1294_v42, %v1276_v15 }
 0x2fe   : > { %v679_v43 = vpack.c.bf16 %v659_v41, %v658_v40 }
 0x2ff   : > { %v1296_v44 = vpop.eup %1295 }
 0x300   : > { %1221 = vmatprep.subr.msk.bf16.mxu0 %vm571_vm0, %v679_v43  ;;  %v754_v45 = vsel %vm571_vm0, %v679_v43, 0  ;;  %v657_v47 = vmul.f32 %v1296_v44, %v1280_v19  ;;  %v1298_v48 = vpop.eup %1297 }
 0x301   : > { %1198 = vmatpush3.bf16.xpose.msra.mxu0 %v754_v45  ;;  %v654_v52 = vmul.f32 %v1298_v48, %v1282_v20 }
 0x302   : > { %v678_v49 = vpack.c.bf16 %v657_v47, %v656_v46 }
 0x303   : > { %v1300_v50 = vpop.eup %1299 }
 0x304   : > { %1222 = vmatprep.subr.msk.bf16.mxu0 %vm571_vm0, %v678_v49  ;;  %v655_v51 = vmul.f32 %v1300_v50, %v1284_v23  ;;  %v751_v53 = vsel %vm571_vm0, %v678_v49, 0 }
 0x306   : > { %v677_v54 = vpack.c.bf16 %v655_v51, %v654_v52 }
 0x307   : > { %v1302_v55 = vpop.eup %1301 }
 0x308   : > { %v1304_v56 = vpop.eup %1303  ;;  %v653_v57 = vmul.f32 %v1302_v55, %v1288_v27  ;;  %v748_v59 = vsel %vm571_vm0, %v677_v54, 0 }
 0x309   : > { %1200 = vmatpush3.bf16.xpose.msra.mxu0 %v751_v53  ;;  %v652_v58 = vmul.f32 %v1304_v56, %v1286_v24 }
 0x30a   : > { %1223 = vmatprep.subr.msk.bf16.mxu0 %vm571_vm0, %v677_v54 }
 0x30b   : > { %v676_v60 = vpack.c.bf16 %v653_v57, %v652_v58 }
 0x30d   : > { %v745_v61 = vsel %vm571_vm0, %v676_v60, 0 }
 0x311   : > { %1202 = vmatpush3.bf16.xpose.msra.mxu0 %v748_v59 }
 0x312   : > { %1224 = vmatprep.subr.msk.bf16.mxu0 %vm571_vm0, %v676_v60 }
 0x319   : > { %1204 = vmatpush3.bf16.xpose.msra.mxu0 %v745_v61 }
 0x320   : > { %1206 = vmatmul.mubr.msk.bf16.vlgmr.msra.gmra.mxu0 %vm571_vm0, %v1266_v62 }
 0x321   : > { %1209 = vmatprep.mubr.msk.bf16.mxu0 %vm571_vm0, %v1267_v63 }
 0x328   : > { %1210 = vmatmul.mubr.msk.bf16.gmra.mxu0 %vm571_vm0, %v1268_v0 }
 0x329   : > { %1213 = vmatprep.mubr.msk.bf16.mxu0 %vm571_vm0, %v1269_v1 }
 0x330   : > { %1214 = vmatmul.mubr.msk.bf16.gmra.mxu0 %vm571_vm0, %v1270_v2 }
 0x331   : > { %1217 = vmatprep.mubr.msk.bf16.mxu0 %vm571_vm0, %v1271_v3 }
 0x338   : > { %1218 = vmatmul.mubr.msk.bf16.gmra.mxu0 %vm571_vm0, %v1272_v4 }
 0x3e0   : > { %v1207_v5 = vpop.f32.mrf.mxu0 }
 0x3e1   : > { %v1111_v6 = vpack.c.bf16 %v1207_v5, %v1207_v5 }
 0x3e2   : > { %v790_v7 = vpop.f32.mrf.mxu0 }
 0x3e3   : > { %920 = vst.msk [vmem:[%s1478_s7 + $0x8] sm:$0xf] %vm917_vm1, %v1111_v6  ;;  %v1109_v8 = vpack.c.bf16 %v790_v7, %v790_v7 }
 0x3e4   : > { %v1208_v9 = vpop.f32.mrf.mxu0 }
 0x3e5   : > { %918 = vst.msk [vmem:[%s1478_s7] sm:$0xf] %vm917_vm1, %v1109_v8  ;;  %v1112_v10 = vpack.c.bf16 %v1208_v9, %v1208_v9 }
 0x3e6   : > { %v793_v11 = vpop.f32.mrf.mxu0 }
 0x3e7   : > { %921 = vst.msk [vmem:[%s1478_s7 + $0xc] sm:$0xf] %vm917_vm1, %v1112_v10  ;;  %v1110_v12 = vpack.c.bf16 %v793_v11, %v793_v11 }
 0x3e8   : > { %v1211_v13 = vpop.f32.mrf.mxu0 }
 0x3e9   : > { %919 = vst.msk [vmem:[%s1478_s7 + $0x4] sm:$0xf] %vm917_vm1, %v1110_v12  ;;  %v1115_v14 = vpack.c.bf16 %v1211_v13, %v1211_v13 }
 0x3ea   : > { %v806_v15 = vpop.f32.mrf.mxu0 }
 0x3eb   : > { %924 = vst.msk [vmem:[%s1478_s7 + $0x18] sm:$0xf] %vm917_vm1, %v1115_v14  ;;  %v1113_v16 = vpack.c.bf16 %v806_v15, %v806_v15 }
 0x3ec   : > { %v1212_v17 = vpop.f32.mrf.mxu0 }
 0x3ed   : > { %922 = vst.msk [vmem:[%s1478_s7 + $0x10] sm:$0xf] %vm917_vm1, %v1113_v16  ;;  %v1116_v18 = vpack.c.bf16 %v1212_v17, %v1212_v17 }
 0x3ee   : > { %v809_v19 = vpop.f32.mrf.mxu0 }
 0x3ef   : > { %925 = vst.msk [vmem:[%s1478_s7 + $0x1c] sm:$0xf] %vm917_vm1, %v1116_v18  ;;  %v1114_v20 = vpack.c.bf16 %v809_v19, %v809_v19 }
 0x3f0   : > { %v1215_v21 = vpop.f32.mrf.mxu0 }
 0x3f1   : > { %923 = vst.msk [vmem:[%s1478_s7 + $0x14] sm:$0xf] %vm917_vm1, %v1114_v20  ;;  %v1119_v22 = vpack.c.bf16 %v1215_v21, %v1215_v21 }
 0x3f2   : > { %v822_v23 = vpop.f32.mrf.mxu0 }
 0x3f3   : > { %928 = vst.msk [vmem:[%s1478_s7 + $0x28] sm:$0xf] %vm917_vm1, %v1119_v22  ;;  %v1117_v24 = vpack.c.bf16 %v822_v23, %v822_v23 }
 0x3f4   : > { %v1216_v25 = vpop.f32.mrf.mxu0 }
 0x3f5   : > { %926 = vst.msk [vmem:[%s1478_s7 + $0x20] sm:$0xf] %vm917_vm1, %v1117_v24  ;;  %v1120_v26 = vpack.c.bf16 %v1216_v25, %v1216_v25 }
 0x3f6   : > { %v825_v27 = vpop.f32.mrf.mxu0 }
 0x3f7   : > { %929 = vst.msk [vmem:[%s1478_s7 + $0x2c] sm:$0xf] %vm917_vm1, %v1120_v26  ;;  %v1118_v28 = vpack.c.bf16 %v825_v27, %v825_v27 }
 0x3f8   : > { %v1219_v29 = vpop.f32.mrf.mxu0 }
 0x3f9   : > { %927 = vst.msk [vmem:[%s1478_s7 + $0x24] sm:$0xf] %vm917_vm1, %v1118_v28  ;;  %v1123_v30 = vpack.c.bf16 %v1219_v29, %v1219_v29 }
 0x3fa   : > { %v838_v31 = vpop.f32.mrf.mxu0 }
 0x3fb   : > { %932 = vst.msk [vmem:[%s1478_s7 + $0x38] sm:$0xf] %vm917_vm1, %v1123_v30  ;;  %v1121_v32 = vpack.c.bf16 %v838_v31, %v838_v31 }
 0x3fc   : > { %v1220_v33 = vpop.f32.mrf.mxu0 }
 0x3fd   : > { %930 = vst.msk [vmem:[%s1478_s7 + $0x30] sm:$0xf] %vm917_vm1, %v1121_v32  ;;  %v1124_v34 = vpack.c.bf16 %v1220_v33, %v1220_v33 }
 0x3fe   : > { %v841_v35 = vpop.f32.mrf.mxu0 }
 0x3ff   : > { %933 = vst.msk [vmem:[%s1478_s7 + $0x3c] sm:$0xf] %vm917_vm1, %v1124_v34  ;;  %v1122_v36 = vpack.c.bf16 %v841_v35, %v841_v35 }
 0x401   : > { %931 = vst.msk [vmem:[%s1478_s7 + $0x34] sm:$0xf] %vm917_vm1, %v1122_v36 }
 0x402 PF: > { %s15_s20 = sadd.s32 1, %s1327_s20   ;;  %s1527_s18 = smov %s1323_s19 }
 0x403   : > { %p12_p5 = scmp.ge.s32.totalorder %s15_s20, 4   ;;  %s1528_s19 = smov %s1530_s21 }
 0x405   :  { %14 = sbr.rel (!%p12_p5) target bundleno = 2 (0x2), region = 76 }

// kernel: maniqa_forward.15
= control target key start
LH: loop header
LB: loop body
LE: loop exit
PB: predicated region body
PF: predicated region fallthrough
CT: control target
= control target key end

     0   :  { %s583_s12 = smov 0   ;;  %s585_s13 = smov 0   ;;  %s629_s0 = inlined_call_operand.vmem [shape: bf16[2,64,128], index: 0, kind: input, shape index: {}]   ;;  %s630_s1 = inlined_call_operand.vmem [shape: bf16[16,64], index: 1, kind: input, shape index: {}]   ;;  %s631_s2 = inlined_call_operand.vmem [shape: f32[16,1], index: 2, kind: input, shape index: {}]   ;;  %s632_s3 = inlined_call_operand.vmem [shape: bf16[2,16,128], index: 3, kind: output, shape index: {}]  }
   0x1   :  { %s587_s14 = smov 0  }
   0x2 LB: > { %s25_s15 = sadd.s32 1, %s554_s13  ;;  %p462_p0 = scmp.ge.s32.totalorder %s558_s14, 1  ;;  %s558_s14 = sphi %s587_s14, %s13_s14   ;;  %s554_s13 = sphi %s585_s13, %s634_s13   ;;  %s550_s12 = sphi %s583_s12, %s633_s12  }
   0x3   : > { %p27_p1 = scmp.ge.s32.totalorder %s25_s15, 2  ;;  %p173_p2 = scmp.lt.s32.totalorder %s558_s14, 3 }
   0x5   : > { %s636_s15 = smov (%p27_p1, %s25_s15), 0  ;;  %p174_p3 = pnand %p462_p0, %p173_p2 }
   0x6   : > { %p211_p4 = scmp.lt.s32.totalorder (!%p174_p3), %s550_s12, 1 }
   0x7   : > { %177 = sbr.rel (%p174_p3) target bundleno = 233 (0xe9), region = 32 }
   0xc   : > { %v560_v0 = vmov 0.0   ;;  %vm561_vm0 = vmmov 0   ;;  %v249_v1 = vld [vmem:[%s631_s2] sm:$0xff]  ;;  %s638_s12 = smov (!%p211_p4, %s550_s12), 1  ;;  %v562_v2 = vmov 0   ;;  %v250_v3 = vld [vmem:[%s631_s2 + $0x8] sm:$0xff] }
   0xd   : > { %491 = vmatprep.subr.bf16.mxu0 %v560_v0  ;;  %499 = vmatprep.mubr.msk.bf16.mxu0 %vm561_vm0, %v560_v0  ;;  %s477_s18 = sshll.u32 %s638_s12, 5  ;;  %v535_v8 = vld [vmem:[%s630_s1] sm:$0xff]   ;;  %vm290_vm1 = vcmask 523264   ;;  %s478_s26 = sshll.u32 %s638_s12, 3 }
   0xe   : > { %530 = vset.pattern.permute.xlu0 %v562_v2  ;;  %s215_s23 = scalar_lea.vmem %s629_s0, %s477_s18  ;;  %s236_s29 = scalar_lea.vmem %s632_s3, %s478_s26 }
   0xf   : > { %253 = vperm.xlu0 %530, %v249_v1   ;;  %v531_v4 = vld [vmem:[%s215_s23 + $0x18] sm:$0xff]   ;;  %v532_v5 = vld [vmem:[%s215_s23 + $0x10] sm:$0xff]   ;;  %v533_v6 = vld [vmem:[%s215_s23 + $0x8] sm:$0xff]  }
  0x10   : > { %492 = vmatpush3.bf16.msra.mxu0 %v531_v4  ;;  %v534_v7 = vld [vmem:[%s215_s23] sm:$0xff]  }
  0x11   : > { %493 = vmatprep.subr.bf16.mxu0 %v560_v0 }
  0x13   : > { %258 = vperm.xlu0 %530, %v250_v3  }
  0x14   : > { %494 = vmatpush3.bf16.msra.mxu0 %v532_v5 }
  0x15   : > { %495 = vmatprep.subr.bf16.mxu0 %v560_v0 }
  0x18   : > { %496 = vmatpush3.bf16.msra.mxu0 %v533_v6 }
  0x19   : > { %497 = vmatprep.subr.bf16.mxu0 %v560_v0 }
  0x1c   : > { %498 = vmatpush3.bf16.msra.mxu0 %v534_v7 }
  0x1f   : > { %500 = vmatmul.mubr.msk.bf16.vlgmr.msra.gmra.mxu0 %vm290_vm1, %v535_v8 }
  0x8a   : > { %v254_v9 = vpop.permute.xlu0 %253 }
  0x8e   : > { %v259_v12 = vpop.permute.xlu0 %258 }
  0xdf   : > { %v328_v10 = vpop.f32.mrf.mxu0 }
  0xe0   : > { %v329_v14 = vadd.f32 %v328_v10, %v254_v9 }
  0xe1   : > { %v501_v11 = vpop.f32.mrf.mxu0 }
  0xe3   : > { %v331_v13 = vpop.f32.mrf.mxu0 }
  0xe4   : > { %v332_v15 = vadd.f32 %v331_v13, %v259_v12 }
  0xe5   : > { %v502_v16 = vpop.f32.mrf.mxu0 }
  0xe6   : > { %v484_v17 = vpack.c.bf16 %v332_v15, %v329_v14 }
  0xe8   : > { %485 = vst [vmem:[%s236_s29] sm:$0xff] %v484_v17  }
  0xe9 PF: > { %s13_s14 = sadd.s32 1, %s558_s14   ;;  %s633_s12 = smov %s554_s13 }
  0xea   : > { %p10_p5 = scmp.ge.s32.totalorder %s13_s14, 4   ;;  %s634_s13 = smov %s636_s15 }
  0xec   :  { %12 = sbr.rel (!%p10_p5) target bundleno = 2 (0x2), region = 68 }

// kernel: maniqa_forward.16
= control target key start
LH: loop header
LB: loop body
LE: loop exit
PB: predicated region body
PF: predicated region fallthrough
CT: control target
= control target key end

     0   :  { %s1154_s21 = smov 0   ;;  %s1156_s22 = smov 0   ;;  %s1331_s0 = inlined_call_operand.vmem [shape: bf16[2,16,128], index: 0, kind: input, shape index: {}]   ;;  %s1332_s1 = inlined_call_operand.vmem [shape: bf16[128,128], index: 1, kind: input, shape index: {}]   ;;  %s1333_s2 = inlined_call_operand.vmem [shape: f32[1,128], index: 2, kind: input, shape index: {}]   ;;  %s1334_s3 = inlined_call_operand.vmem [shape: bf16[128,128], index: 3, kind: input, shape index: {}]   ;;  %s1335_s4 = inlined_call_operand.vmem [shape: f32[128,1], index: 4, kind: input, shape index: {}]   ;;  %s1336_s5 = inlined_call_operand.vmem [shape: bf16[2,16,128], index: 5, kind: output, shape index: {0}]   ;;  %s1337_s6 = inlined_call_operand.vmem [shape: bf16[2,128,16], index: 6, kind: output, shape index: {1}]  }
   0x1   :  { %s1158_s23 = smov 0  }
   0x2 LB: > { %s29_s24 = sadd.s32 1, %s1110_s22  ;;  %p919_p0 = scmp.ge.s32.totalorder %s1114_s23, 1  ;;  %s1114_s23 = sphi %s1158_s23, %s17_s23   ;;  %s1110_s22 = sphi %s1156_s22, %s1339_s22   ;;  %s1106_s21 = sphi %s1154_s21, %s1338_s21  }
   0x3   : > { %p31_p1 = scmp.ge.s32.totalorder %s29_s24, 2  ;;  %p238_p2 = scmp.lt.s32.totalorder %s1114_s23, 3 }
   0x5   : > { %s1341_s24 = smov (%p31_p1, %s29_s24), 0  ;;  %p239_p3 = pnand %p919_p0, %p238_p2 }
   0x6   : > { %p285_p4 = scmp.lt.s32.totalorder (!%p239_p3), %s1106_s21, 1 }
   0x7   : > { %242 = sbr.rel (%p239_p3) target bundleno = 252 (0xfc), region = 40 }
   0xc   : > { %v1075_v0 = vld [vmem:[%s1332_s1 + $0x38] sm:$0xff]   ;;  %v1116_v1 = vmov 0.0   ;;  %v1077_v2 = vld [vmem:[%s1332_s1 + $0x30] sm:$0xff]   ;;  %s1343_s21 = smov (!%p285_p4, %s1106_s21), 1  ;;  %v1079_v3 = vld [vmem:[%s1334_s3] sm:$0xff]   ;;  %vm1117_vm0 = vmmov 0  }
   0xd   : > { %1008 = vmatprep.subr.bf16.mxu0 %v1116_v1  ;;  %1024 = vmatprep.mubr.msk.bf16.mxu0 %vm1117_vm0, %v1116_v1  ;;  %s964_s7 = sshll.u32 %s1343_s21, 3  ;;  %v1118_v4 = vmov 0   ;;  %v1078_v5 = vld [vmem:[%s1332_s1 + $0x28] sm:$0xff]   ;;  %v1081_v7 = vld [vmem:[%s1332_s1 + $0x20] sm:$0xff]   ;;  %v1082_v9 = vld [vmem:[%s1332_s1 + $0x18] sm:$0xff]   ;;  %s966_s12 = sshll.u32 %s1343_s21, 6 }
   0xe   : > { %1009 = vmatpush3.bf16.msra.mxu0 %v1075_v0  ;;  %1030 = vmatprep.mubr.bf16.mxu1 %v1079_v3  ;;  %s292_s10 = scalar_lea.vmem %s1331_s0, %s964_s7  ;;  %v1080_v8 = vld [vmem:[%s1334_s3 + $0x8] sm:$0xff]   ;;  %v1083_v10 = vld [vmem:[%s1334_s3 + $0x10] sm:$0xff]   ;;  %v459_v12 = vld [vmem:[%s1335_s4] sm:$0xff]  ;;  %s1280_s15 = scalar_lea.vmem %s1337_s6, %s966_s12  ;;  %vm764_vm1 = vcmask 125952  }
   0xf   : > { %1010 = vmatprep.subr.bf16.mxu0 %v1116_v1  ;;  %1074 = vset.pattern.permute.xlu1 %v1118_v4  ;;  %v1076_v6 = vld [vmem:[%s292_s10] sm:$0xff]   ;;  %v461_v11 = vld [vmem:[%s1335_s4 + $0x10] sm:$0xff]  ;;  %v462_v14 = vld [vmem:[%s1335_s4 + $0x18] sm:$0xff]  ;;  %s302_s20 = scalar_lea.vmem %s1336_s5, %s964_s7 }
  0x10   : > { %1073 = vset.pattern.permute.xlu0 %v1118_v4  ;;  %1028 = vmatprep.subr.bf16.mxu1 %v1076_v6  ;;  %v1085_v13 = vld [vmem:[%s1332_s1 + $0x10] sm:$0xff]   ;;  %v1084_v15 = vld [vmem:[%s1334_s3 + $0x18] sm:$0xff]   ;;  %v460_v16 = vld [vmem:[%s1335_s4 + $0x8] sm:$0xff] }
  0x11   : > { %1029 = vmatpush3.bf16.xpose.msra.mxu1 %v1076_v6  ;;  %487 = vperm.xlu1 %1074, %v461_v11   ;;  %v1086_v17 = vld [vmem:[%s1332_s1 + $0x8] sm:$0xff]   ;;  %v1087_v18 = vld [vmem:[%s1334_s3 + $0x20] sm:$0xff]   ;;  %v466_v22 = vld [vmem:[%s1335_s4 + $0x38] sm:$0xff] }
  0x12   : > { %1011 = vmatpush3.bf16.msra.mxu0 %v1077_v2  ;;  %477 = vperm.xlu0 %1073, %v459_v12   ;;  %v464_v19 = vld [vmem:[%s1335_s4 + $0x28] sm:$0xff]  ;;  %v463_v20 = vld [vmem:[%s1335_s4 + $0x20] sm:$0xff]  ;;  %v465_v24 = vld [vmem:[%s1335_s4 + $0x30] sm:$0xff] }
  0x13   : > { %1012 = vmatprep.subr.bf16.mxu0 %v1116_v1  ;;  %v1089_v21 = vld [vmem:[%s1332_s1] sm:$0xff]   ;;  %v1088_v23 = vld [vmem:[%s1334_s3 + $0x28] sm:$0xff]   ;;  %v1090_v25 = vld [vmem:[%s1334_s3 + $0x30] sm:$0xff]  }
  0x14   : > { %v468_v26 = vld [vmem:[%s1335_s4 + $0x48] sm:$0xff]  ;;  %v467_v27 = vld [vmem:[%s1335_s4 + $0x40] sm:$0xff]  ;;  %v470_v28 = vld [vmem:[%s1335_s4 + $0x58] sm:$0xff] }
  0x15   : > { %492 = vperm.xlu1 %1074, %v462_v14   ;;  %v1091_v29 = vld [vmem:[%s1334_s3 + $0x38] sm:$0xff]   ;;  %v469_v30 = vld [vmem:[%s1335_s4 + $0x50] sm:$0xff]  ;;  %v472_v31 = vld [vmem:[%s1335_s4 + $0x68] sm:$0xff] }
  0x16   : > { %1013 = vmatpush3.bf16.msra.mxu0 %v1078_v5  ;;  %482 = vperm.xlu0 %1073, %v460_v16   ;;  %v471_v32 = vld [vmem:[%s1335_s4 + $0x60] sm:$0xff]  ;;  %v474_v33 = vld [vmem:[%s1335_s4 + $0x78] sm:$0xff]  ;;  %v473_v34 = vld [vmem:[%s1335_s4 + $0x70] sm:$0xff] }
  0x17   : > { %1014 = vmatprep.subr.bf16.mxu0 %v1116_v1 }
  0x18   : > { %1031 = vmatmul.mubr.bf16.vlgmr.msra.gmra.mxu1 %v1080_v8 }
  0x19   : > { %1034 = vmatprep.mubr.bf16.mxu1 %v1083_v10  ;;  %502 = vperm.xlu1 %1074, %v464_v19  }
  0x1a   : > { %1015 = vmatpush3.bf16.msra.mxu0 %v1081_v7  ;;  %497 = vperm.xlu0 %1073, %v463_v20   ;;  %v926_v7 = vld [vmem:[%s1333_s2] ss:$0 sm:$0xff] }
  0x1b   : > { %1016 = vmatprep.subr.bf16.mxu0 %v1116_v1 }
  0x1d   : > { %512 = vperm.xlu1 %1074, %v466_v22  }
  0x1e   : > { %1017 = vmatpush3.bf16.msra.mxu0 %v1082_v9  ;;  %507 = vperm.xlu0 %1073, %v465_v24  }
  0x1f   : > { %1018 = vmatprep.subr.bf16.mxu0 %v1116_v1 }
  0x20   : > { %1035 = vmatmul.mubr.bf16.gmra.mxu1 %v1084_v15 }
  0x21   : > { %1038 = vmatprep.mubr.bf16.mxu1 %v1087_v18  ;;  %522 = vperm.xlu1 %1074, %v468_v26  }
  0x22   : > { %1019 = vmatpush3.bf16.msra.mxu0 %v1085_v13  ;;  %517 = vperm.xlu0 %1073, %v467_v27  }
  0x23   : > { %1020 = vmatprep.subr.bf16.mxu0 %v1116_v1 }
  0x25   : > { %532 = vperm.xlu1 %1074, %v470_v28  }
  0x26   : > { %1021 = vmatpush3.bf16.msra.mxu0 %v1086_v17  ;;  %527 = vperm.xlu0 %1073, %v469_v30  }
  0x27   : > { %1022 = vmatprep.subr.bf16.mxu0 %v1116_v1 }
  0x28   : > { %1039 = vmatmul.mubr.bf16.gmra.mxu1 %v1088_v23 }
  0x29   : > { %1042 = vmatprep.mubr.bf16.mxu1 %v1090_v25  ;;  %542 = vperm.xlu1 %1074, %v472_v31  }
  0x2a   : > { %1023 = vmatpush3.bf16.msra.mxu0 %v1089_v21  ;;  %537 = vperm.xlu0 %1073, %v471_v32  }
  0x2d   : > { %1025 = vmatmul.mubr.bf16.vlgmr.msra.gmra.mxu0 %v1076_v6  ;;  %552 = vperm.xlu1 %1074, %v474_v33  }
  0x2e   : > { %547 = vperm.xlu0 %1073, %v473_v34  }
  0x30   : > { %1043 = vmatmul.mubr.bf16.gmra.mxu1 %v1091_v29 }
  0x8c   : > { %v488_v36 = vpop.permute.xlu1 %487 }
  0x8d   : > { %v478_v35 = vpop.permute.xlu0 %477 }
  0x90   : > { %v493_v38 = vpop.permute.xlu1 %492 }
  0x91   : > { %v483_v37 = vpop.permute.xlu0 %482 }
  0x94   : > { %v503_v40 = vpop.permute.xlu1 %502 }
  0x95   : > { %v498_v39 = vpop.permute.xlu0 %497 }
  0x98   : > { %v513_v45 = vpop.permute.xlu1 %512 }
  0x99   : > { %v508_v41 = vpop.permute.xlu0 %507 }
  0x9c   : > { %v523_v56 = vpop.permute.xlu1 %522 }
  0x9d   : > { %v518_v49 = vpop.permute.xlu0 %517 }
  0xa0   : > { %v533_v3 = vpop.permute.xlu1 %532 }
  0xa1   : > { %v528_v60 = vpop.permute.xlu0 %527 }
  0xa4   : > { %v543_v19 = vpop.permute.xlu1 %542 }
  0xa5   : > { %v538_v9 = vpop.permute.xlu0 %537 }
  0xa9   : > { %v548_v28 = vpop.permute.xlu0 %547 }
  0xd8   : > { %v1032_v42 = vpop.f32.mrf.mxu1 }
  0xd9   : > { %v646_v43 = vadd.f32 %v1032_v42, %v488_v36 }
  0xda   : > { %v637_v44 = vpop.f32.mrf.mxu1 }
  0xdb   : > { %v971_v46 = vpack.c.bf16 %v646_v43, %v646_v43  ;;  %v638_v47 = vadd.f32 %v637_v44, %v478_v35  ;;  %v553_v35 = vpop.permute.xlu1 %552 }
  0xdc   : > { %v1033_v48 = vpop.f32.mrf.mxu1 }
  0xdd   : > { %767 = vst.msk [vmem:[%s1280_s15 + $0x8] sm:$0xf] %vm764_vm1, %v971_v46  ;;  %v969_v50 = vpack.c.bf16 %v638_v47, %v638_v47  ;;  %v649_v51 = vadd.f32 %v1033_v48, %v493_v38 }
  0xde   : > { %v640_v52 = vpop.f32.mrf.mxu1 }
  0xdf   : > { %765 = vst.msk [vmem:[%s1280_s15] sm:$0xf] %vm764_vm1, %v969_v50  ;;  %v972_v53 = vpack.c.bf16 %v649_v51, %v649_v51  ;;  %v641_v54 = vadd.f32 %v640_v52, %v483_v37 }
  0xe0   : > { %v1036_v55 = vpop.f32.mrf.mxu1 }
  0xe1   : > { %768 = vst.msk [vmem:[%s1280_s15 + $0xc] sm:$0xf] %vm764_vm1, %v972_v53  ;;  %v970_v57 = vpack.c.bf16 %v641_v54, %v641_v54  ;;  %v662_v58 = vadd.f32 %v1036_v55, %v508_v41 }
  0xe2   : > { %v653_v59 = vpop.f32.mrf.mxu1 }
  0xe3   : > { %766 = vst.msk [vmem:[%s1280_s15 + $0x4] sm:$0xf] %vm764_vm1, %v970_v57  ;;  %v975_v61 = vpack.c.bf16 %v662_v58, %v662_v58  ;;  %v654_v62 = vadd.f32 %v653_v59, %v498_v39 }
  0xe4   : > { %v1037_v63 = vpop.f32.mrf.mxu1 }
  0xe5   : > { %771 = vst.msk [vmem:[%s1280_s15 + $0x18] sm:$0xf] %vm764_vm1, %v975_v61  ;;  %v973_v0 = vpack.c.bf16 %v654_v62, %v654_v62  ;;  %v665_v1 = vadd.f32 %v1037_v63, %v513_v45 }
  0xe6   : > { %v656_v2 = vpop.f32.mrf.mxu1 }
  0xe7   : > { %769 = vst.msk [vmem:[%s1280_s15 + $0x10] sm:$0xf] %vm764_vm1, %v973_v0  ;;  %v976_v4 = vpack.c.bf16 %v665_v1, %v665_v1  ;;  %v657_v5 = vadd.f32 %v656_v2, %v503_v40 }
  0xe8   : > { %v1040_v6 = vpop.f32.mrf.mxu1 }
  0xe9   : > { %772 = vst.msk [vmem:[%s1280_s15 + $0x1c] sm:$0xf] %vm764_vm1, %v976_v4  ;;  %v974_v10 = vpack.c.bf16 %v657_v5, %v657_v5  ;;  %v678_v11 = vadd.f32 %v1040_v6, %v528_v60 }
  0xea   : > { %v669_v12 = vpop.f32.mrf.mxu1 }
  0xeb   : > { %770 = vst.msk [vmem:[%s1280_s15 + $0x14] sm:$0xf] %vm764_vm1, %v974_v10  ;;  %v979_v14 = vpack.c.bf16 %v678_v11, %v678_v11  ;;  %v670_v15 = vadd.f32 %v669_v12, %v518_v49 }
  0xec   : > { %v1041_v17 = vpop.f32.mrf.mxu1 }
  0xed   : > { %v426_v8 = vpop.f32.mrf.mxu0  ;;  %775 = vst.msk [vmem:[%s1280_s15 + $0x28] sm:$0xf] %vm764_vm1, %v979_v14  ;;  %v977_v20 = vpack.c.bf16 %v670_v15, %v670_v15  ;;  %v681_v21 = vadd.f32 %v1041_v17, %v533_v3 }
  0xee   : > { %v427_v16 = vadd.f32 %v926_v7, %v426_v8  ;;  %v672_v23 = vpop.f32.mrf.mxu1 }
  0xef   : > { %v1026_v13 = vpop.f32.mrf.mxu0  ;;  %773 = vst.msk [vmem:[%s1280_s15 + $0x20] sm:$0xf] %vm764_vm1, %v977_v20  ;;  %v980_v25 = vpack.c.bf16 %v681_v21, %v681_v21  ;;  %v673_v26 = vadd.f32 %v672_v23, %v523_v56 }
  0xf0   : > { %v1044_v29 = vpop.f32.mrf.mxu1 }
  0xf1   : > { %v429_v18 = vpop.f32.mrf.mxu0  ;;  %776 = vst.msk [vmem:[%s1280_s15 + $0x2c] sm:$0xf] %vm764_vm1, %v980_v25  ;;  %v978_v30 = vpack.c.bf16 %v673_v26, %v673_v26  ;;  %v694_v31 = vadd.f32 %v1044_v29, %v548_v28 }
  0xf2   : > { %v430_v22 = vadd.f32 %v926_v7, %v429_v18  ;;  %v685_v32 = vpop.f32.mrf.mxu1 }
  0xf3   : > { %v1027_v24 = vpop.f32.mrf.mxu0  ;;  %774 = vst.msk [vmem:[%s1280_s15 + $0x24] sm:$0xf] %vm764_vm1, %v978_v30  ;;  %v983_v33 = vpack.c.bf16 %v694_v31, %v694_v31  ;;  %v686_v34 = vadd.f32 %v685_v32, %v538_v9 }
  0xf4   : > { %v988_v27 = vpack.c.bf16 %v430_v22, %v427_v16  ;;  %v1045_v36 = vpop.f32.mrf.mxu1 }
  0xf5   : > { %779 = vst.msk [vmem:[%s1280_s15 + $0x38] sm:$0xf] %vm764_vm1, %v983_v33  ;;  %v981_v37 = vpack.c.bf16 %v686_v34, %v686_v34  ;;  %v697_v38 = vadd.f32 %v1045_v36, %v553_v35 }
  0xf6   : > { %989 = vst [vmem:[%s302_s20] sm:$0xff] %v988_v27   ;;  %v688_v39 = vpop.f32.mrf.mxu1 }
  0xf7   : > { %777 = vst.msk [vmem:[%s1280_s15 + $0x30] sm:$0xf] %vm764_vm1, %v981_v37  ;;  %v984_v40 = vpack.c.bf16 %v697_v38, %v697_v38  ;;  %v689_v41 = vadd.f32 %v688_v39, %v543_v19 }
  0xf9   : > { %780 = vst.msk [vmem:[%s1280_s15 + $0x3c] sm:$0xf] %vm764_vm1, %v984_v40  ;;  %v982_v42 = vpack.c.bf16 %v689_v41, %v689_v41 }
  0xfb   : > { %778 = vst.msk [vmem:[%s1280_s15 + $0x34] sm:$0xf] %vm764_vm1, %v982_v42 }
  0xfc PF: > { %s17_s23 = sadd.s32 1, %s1114_s23   ;;  %s1338_s21 = smov %s1110_s22 }
  0xfd   : > { %p14_p5 = scmp.ge.s32.totalorder %s17_s23, 4   ;;  %s1339_s22 = smov %s1341_s24 }
  0xff   :  { %16 = sbr.rel (!%p14_p5) target bundleno = 2 (0x2), region = 82 }

// kernel: maniqa_forward.17
= control target key start
LH: loop header
LB: loop body
LE: loop exit
PB: predicated region body
PF: predicated region fallthrough
CT: control target
= control target key end

     0   :  { %s1115_s18 = smov 0   ;;  %s1117_s19 = smov 0   ;;  %s1247_s0 = inlined_call_operand.vmem [shape: bf16[2,16,128], index: 0, kind: input, shape index: {}]   ;;  %s1248_s1 = inlined_call_operand.vmem [shape: bf16[128,128], index: 1, kind: input, shape index: {}]   ;;  %s1249_s2 = inlined_call_operand.vmem [shape: f32[1,128], index: 2, kind: input, shape index: {}]   ;;  %s1250_s3 = inlined_call_operand.vmem [shape: bf16[2,16,128], index: 3, kind: input, shape index: {}]   ;;  %s1251_s4 = inlined_call_operand.vmem [shape: bf16[2,128,16], index: 4, kind: input, shape index: {}]   ;;  %s1252_s5 = inlined_call_operand.vmem [shape: bf16[2,128,16], index: 5, kind: output, shape index: {}]  }
   0x1   :  { %s1119_s20 = smov 0  }
   0x2 LB: > { %s27_s21 = sadd.s32 1, %s1077_s19  ;;  %p868_p0 = scmp.ge.s32.totalorder %s1081_s20, 1  ;;  %s1081_s20 = sphi %s1119_s20, %s15_s20   ;;  %s1077_s19 = sphi %s1117_s19, %s1254_s19   ;;  %s1073_s18 = sphi %s1115_s18, %s1253_s18  }
   0x3   : > { %p29_p1 = scmp.ge.s32.totalorder %s27_s21, 2  ;;  %p228_p2 = scmp.lt.s32.totalorder %s1081_s20, 3 }
   0x5   : > { %s1256_s21 = smov (%p29_p1, %s27_s21), 0  ;;  %p229_p3 = pnand %p868_p0, %p228_p2 }
   0x6   : > { %p274_p4 = scmp.lt.s32.totalorder (!%p229_p3), %s1073_s18, 1 }
   0x7   : > { %232 = sbr.rel (%p229_p3) target bundleno = 991 (0x3df), region = 40 }
   0xc   : > { %v1033_v0 = vld [vmem:[%s1248_s1 + $0x38] sm:$0xff]   ;;  %v1083_v1 = vmov 0.0   ;;  %v1034_v2 = vld [vmem:[%s1248_s1 + $0x30] sm:$0xff]   ;;  %vm1084_vm0 = vmmov 0   ;;  %s1258_s18 = smov (!%p274_p4, %s1073_s18), 1  ;;  %v1035_v3 = vld [vmem:[%s1248_s1 + $0x28] sm:$0xff]  }
   0xd   : > { %962 = vmatprep.subr.bf16.mxu0 %v1083_v1  ;;  %982 = vmatprep.subr.bf16.mxu1 %v1083_v1  ;;  %s922_s28 = sshll.u32 %s1258_s18, 3  ;;  %s924_s7 = sshll.u32 %s1258_s18, 6  ;;  %v1036_v4 = vld [vmem:[%s1248_s1 + $0x20] sm:$0xff]   ;;  %v1037_v5 = vld [vmem:[%s1248_s1 + $0x18] sm:$0xff]   ;;  %v1038_v6 = vld [vmem:[%s1248_s1 + $0x10] sm:$0xff]   ;;  %vm472_vm1 = vcmask 130048  }
   0xe   : > { %963 = vmatpush3.bf16.msra.mxu0 %v1033_v0  ;;  %978 = vmatprep.mubr.msk.bf16.mxu0 %vm1084_vm0, %v1083_v1  ;;  %s281_s6 = scalar_lea.vmem %s1247_s0, %s922_s28  ;;  %s1154_s10 = scalar_lea.vmem %s1251_s4, %s924_s7  ;;  %v1039_v7 = vld [vmem:[%s1248_s1 + $0x8] sm:$0xff]   ;;  %v1040_v8 = vld [vmem:[%s1248_s1] sm:$0xff]   ;;  %vm740_vm2 = vcmask 125952  }
   0xf   : > { %964 = vmatprep.subr.bf16.mxu0 %v1083_v1  ;;  %984 = vmatprep.mubr.msk.bf16.mxu1 %vm1084_vm0, %v1083_v1  ;;  %v1041_v9 = vld [vmem:[%s281_s6] sm:$0xff]   ;;  %s287_s27 = scalar_lea.vmem %s1250_s3, %s922_s28  ;;  %v1044_v44 = vld [vmem:[%s1154_s10 + $0x8] sm:$0xff]   ;;  %v1045_v45 = vld [vmem:[%s1154_s10 + $0x10] sm:$0xff]   ;;  %s1204_s8 = scalar_lea.vmem %s1252_s5, %s924_s7 }
  0x10   : > { %v1042_v10 = vld [vmem:[%s287_s27] sm:$0xff]   ;;  %v1046_v46 = vld [vmem:[%s1154_s10 + $0x18] sm:$0xff]   ;;  %v1048_v48 = vld [vmem:[%s1154_s10 + $0x28] sm:$0xff]  }
  0x11   : > { %983 = vmatpush3.bf16.xpose.msra.mxu1 %v1042_v10  ;;  %v877_v12 = vld [vmem:[%s1249_s2] ss:$0 sm:$0xff]  ;;  %v1049_v49 = vld [vmem:[%s1154_s10 + $0x30] sm:$0xff]   ;;  %v1050_v50 = vld [vmem:[%s1154_s10 + $0x38] sm:$0xff]  }
  0x12   : > { %965 = vmatpush3.bf16.msra.mxu0 %v1034_v2  ;;  %v1043_v35 = vld [vmem:[%s1154_s10] sm:$0xff]  }
  0x13   : > { %966 = vmatprep.subr.bf16.mxu0 %v1083_v1  ;;  %v1047_v47 = vld [vmem:[%s1154_s10 + $0x20] sm:$0xff]  }
  0x16   : > { %967 = vmatpush3.bf16.msra.mxu0 %v1035_v3 }
  0x17   : > { %968 = vmatprep.subr.bf16.mxu0 %v1083_v1 }
  0x1a   : > { %969 = vmatpush3.bf16.msra.mxu0 %v1036_v4 }
  0x1b   : > { %970 = vmatprep.subr.bf16.mxu0 %v1083_v1 }
  0x1e   : > { %971 = vmatpush3.bf16.msra.mxu0 %v1037_v5 }
  0x1f   : > { %972 = vmatprep.subr.bf16.mxu0 %v1083_v1 }
  0x22   : > { %973 = vmatpush3.bf16.msra.mxu0 %v1038_v6 }
  0x23   : > { %974 = vmatprep.subr.bf16.mxu0 %v1083_v1 }
  0x26   : > { %975 = vmatpush3.bf16.msra.mxu0 %v1039_v7 }
  0x27   : > { %976 = vmatprep.subr.bf16.mxu0 %v1083_v1 }
  0x2a   : > { %977 = vmatpush3.bf16.msra.mxu0 %v1040_v8 }
  0x2d   : > { %979 = vmatmul.mubr.bf16.vlgmr.msra.gmra.mxu0 %v1041_v9 }
  0xed   : > { %v415_v11 = vpop.f32.mrf.mxu0 }
  0xee   : > { %v416_v15 = vadd.f32 %v877_v12, %v415_v11 }
  0xef   : > { %v980_v13 = vpop.f32.mrf.mxu0 }
  0xf1   : > { %v418_v14 = vpop.f32.mrf.mxu0 }
  0xf2   : > { %v419_v16 = vadd.f32 %v877_v12, %v418_v14 }
  0xf3   : > { %v981_v17 = vpop.f32.mrf.mxu0 }
  0xf4   : > { %v422_v18 = vpack.c.bf16 %v419_v16, %v416_v15 }
  0xf6   : > { %985 = vmatmul.mubr.bf16.vlgmr.msra.gmra.mxu1 %v422_v18 }
  0xf7   : > { %990 = vmatprep.mubr.msk.bf16.mxu1 %vm472_vm1, %v1043_v35 }
 0x1b6   : > { %v465_v19 = vpop.f32.mrf.mxu1 }
 0x1b7   : > { %v473_v20 = vsel %vm472_vm1, %v465_v19, -inf }
 0x1b8   : > { %474 = vmax.xlane.f32.xlu0 %v473_v20  ;;  %v986_v21 = vpop.f32.mrf.mxu1 }
 0x1ba   : > { %v468_v22 = vpop.f32.mrf.mxu1 }
 0x1bb   : > { %v476_v23 = vsel %vm472_vm1, %v468_v22, -inf }
 0x1bc   : > { %477 = vmax.xlane.f32.xlu0 %v476_v23  ;;  %v987_v24 = vpop.f32.mrf.mxu1 }
 0x241   : > { %v475_v25 = vpop.xlane.xlu0 %474 }
 0x242   : > { %v479_v26 = vsub.f32 %v465_v19, %v475_v25 }
 0x244   : > { %v481_v27 = vmul.f32 1.442695, %v479_v26 }
 0x245   : > { %v478_v28 = vpop.xlane.xlu0 %477 }
 0x246   : > { %1051 = vpow2.f32 %v481_v27  ;;  %v480_v29 = vsub.f32 %v468_v22, %v478_v28 }
 0x248   : > { %v483_v30 = vmul.f32 1.442695, %v480_v29 }
 0x24a   : > { %1053 = vpow2.f32 %v483_v30 }
 0x253   : > { %v1052_v31 = vpop.eup %1051 }
 0x254   : > { %v485_v32 = vsel %vm472_vm1, %v1052_v31, 0.0 }
 0x255   : > { %486 = vadd.xlane.f32.xlu1 %v485_v32 }
 0x257   : > { %v1054_v33 = vpop.eup %1053 }
 0x258   : > { %v488_v34 = vsel %vm472_vm1, %v1054_v33, 0.0 }
 0x259   : > { %489 = vadd.xlane.f32.xlu1 %v488_v34 }
 0x2de   : > { %v487_v36 = vpop.xlane.xlu1 %486 }
 0x2df   : > { %1055 = vrcp.f32 %v487_v36 }
 0x2e2   : > { %v490_v37 = vpop.xlane.xlu1 %489 }
 0x2e3   : > { %1057 = vrcp.f32 %v490_v37 }
 0x2ec   : > { %v1056_v38 = vpop.eup %1055 }
 0x2ed   : > { %v493_v40 = vmul.f32 %v1056_v38, %v1052_v31 }
 0x2f0   : > { %v1058_v39 = vpop.eup %1057 }
 0x2f1   : > { %v494_v41 = vmul.f32 %v1058_v39, %v1054_v33 }
 0x2f3   : > { %v511_v42 = vpack.c.bf16 %v494_v41, %v493_v40 }
 0x2f5   : > { %1006 = vmatprep.subr.msk.bf16.mxu1 %vm472_vm1, %v511_v42  ;;  %v577_v43 = vsel %vm472_vm1, %v511_v42, 0 }
 0x2f6   : > { %989 = vmatpush3.bf16.xpose.msra.mxu1 %v577_v43 }
 0x2fd   : > { %991 = vmatmul.mubr.msk.bf16.vlgmr.msra.gmra.mxu1 %vm472_vm1, %v1044_v44 }
 0x2fe   : > { %994 = vmatprep.mubr.msk.bf16.mxu1 %vm472_vm1, %v1045_v45 }
 0x305   : > { %995 = vmatmul.mubr.msk.bf16.gmra.mxu1 %vm472_vm1, %v1046_v46 }
 0x306   : > { %998 = vmatprep.mubr.msk.bf16.mxu1 %vm472_vm1, %v1047_v47 }
 0x30d   : > { %999 = vmatmul.mubr.msk.bf16.gmra.mxu1 %vm472_vm1, %v1048_v48 }
 0x30e   : > { %1002 = vmatprep.mubr.msk.bf16.mxu1 %vm472_vm1, %v1049_v49 }
 0x315   : > { %1003 = vmatmul.mubr.msk.bf16.gmra.mxu1 %vm472_vm1, %v1050_v50 }
 0x3bd   : > { %v992_v51 = vpop.f32.mrf.mxu1 }
 0x3be   : > { %v928_v52 = vpack.c.bf16 %v992_v51, %v992_v51 }
 0x3bf   : > { %v613_v53 = vpop.f32.mrf.mxu1 }
 0x3c0   : > { %743 = vst.msk [vmem:[%s1204_s8 + $0x8] sm:$0xf] %vm740_vm2, %v928_v52  ;;  %v926_v54 = vpack.c.bf16 %v613_v53, %v613_v53 }
 0x3c1   : > { %v993_v55 = vpop.f32.mrf.mxu1 }
 0x3c2   : > { %741 = vst.msk [vmem:[%s1204_s8] sm:$0xf] %vm740_vm2, %v926_v54  ;;  %v929_v56 = vpack.c.bf16 %v993_v55, %v993_v55 }
 0x3c3   : > { %v616_v57 = vpop.f32.mrf.mxu1 }
 0x3c4   : > { %744 = vst.msk [vmem:[%s1204_s8 + $0xc] sm:$0xf] %vm740_vm2, %v929_v56  ;;  %v927_v58 = vpack.c.bf16 %v616_v57, %v616_v57 }
 0x3c5   : > { %v996_v59 = vpop.f32.mrf.mxu1 }
 0x3c6   : > { %742 = vst.msk [vmem:[%s1204_s8 + $0x4] sm:$0xf] %vm740_vm2, %v927_v58  ;;  %v932_v60 = vpack.c.bf16 %v996_v59, %v996_v59 }
 0x3c7   : > { %v629_v61 = vpop.f32.mrf.mxu1 }
 0x3c8   : > { %747 = vst.msk [vmem:[%s1204_s8 + $0x18] sm:$0xf] %vm740_vm2, %v932_v60  ;;  %v930_v62 = vpack.c.bf16 %v629_v61, %v629_v61 }
 0x3c9   : > { %v997_v63 = vpop.f32.mrf.mxu1 }
 0x3ca   : > { %745 = vst.msk [vmem:[%s1204_s8 + $0x10] sm:$0xf] %vm740_vm2, %v930_v62  ;;  %v933_v0 = vpack.c.bf16 %v997_v63, %v997_v63 }
 0x3cb   : > { %v632_v1 = vpop.f32.mrf.mxu1 }
 0x3cc   : > { %748 = vst.msk [vmem:[%s1204_s8 + $0x1c] sm:$0xf] %vm740_vm2, %v933_v0  ;;  %v931_v2 = vpack.c.bf16 %v632_v1, %v632_v1 }
 0x3cd   : > { %v1000_v3 = vpop.f32.mrf.mxu1 }
 0x3ce   : > { %746 = vst.msk [vmem:[%s1204_s8 + $0x14] sm:$0xf] %vm740_vm2, %v931_v2  ;;  %v936_v4 = vpack.c.bf16 %v1000_v3, %v1000_v3 }
 0x3cf   : > { %v645_v5 = vpop.f32.mrf.mxu1 }
 0x3d0   : > { %751 = vst.msk [vmem:[%s1204_s8 + $0x28] sm:$0xf] %vm740_vm2, %v936_v4  ;;  %v934_v6 = vpack.c.bf16 %v645_v5, %v645_v5 }
 0x3d1   : > { %v1001_v7 = vpop.f32.mrf.mxu1 }
 0x3d2   : > { %749 = vst.msk [vmem:[%s1204_s8 + $0x20] sm:$0xf] %vm740_vm2, %v934_v6  ;;  %v937_v8 = vpack.c.bf16 %v1001_v7, %v1001_v7 }
 0x3d3   : > { %v648_v9 = vpop.f32.mrf.mxu1 }
 0x3d4   : > { %752 = vst.msk [vmem:[%s1204_s8 + $0x2c] sm:$0xf] %vm740_vm2, %v937_v8  ;;  %v935_v10 = vpack.c.bf16 %v648_v9, %v648_v9 }
 0x3d5   : > { %v1004_v11 = vpop.f32.mrf.mxu1 }
 0x3d6   : > { %750 = vst.msk [vmem:[%s1204_s8 + $0x24] sm:$0xf] %vm740_vm2, %v935_v10  ;;  %v940_v12 = vpack.c.bf16 %v1004_v11, %v1004_v11 }
 0x3d7   : > { %v661_v13 = vpop.f32.mrf.mxu1 }
 0x3d8   : > { %755 = vst.msk [vmem:[%s1204_s8 + $0x38] sm:$0xf] %vm740_vm2, %v940_v12  ;;  %v938_v14 = vpack.c.bf16 %v661_v13, %v661_v13 }
 0x3d9   : > { %v1005_v15 = vpop.f32.mrf.mxu1 }
 0x3da   : > { %753 = vst.msk [vmem:[%s1204_s8 + $0x30] sm:$0xf] %vm740_vm2, %v938_v14  ;;  %v941_v16 = vpack.c.bf16 %v1005_v15, %v1005_v15 }
 0x3db   : > { %v664_v17 = vpop.f32.mrf.mxu1 }
 0x3dc   : > { %756 = vst.msk [vmem:[%s1204_s8 + $0x3c] sm:$0xf] %vm740_vm2, %v941_v16  ;;  %v939_v18 = vpack.c.bf16 %v664_v17, %v664_v17 }
 0x3de   : > { %754 = vst.msk [vmem:[%s1204_s8 + $0x34] sm:$0xf] %vm740_vm2, %v939_v18 }
 0x3df PF: > { %s15_s20 = sadd.s32 1, %s1081_s20   ;;  %s1253_s18 = smov %s1077_s19 }
 0x3e0   : > { %p12_p5 = scmp.ge.s32.totalorder %s15_s20, 4   ;;  %s1254_s19 = smov %s1256_s21 }
 0x3e2   :  { %14 = sbr.rel (!%p12_p5) target bundleno = 2 (0x2), region = 76 }

// kernel: maniqa_forward.20
= control target key start
LH: loop header
LB: loop body
LE: loop exit
PB: predicated region body
PF: predicated region fallthrough
CT: control target
= control target key end

     0   :  { %s486_s12 = smov 0   ;;  %s488_s13 = smov 0   ;;  %s525_s0 = inlined_call_operand.vmem [shape: bf16[2,16,128], index: 0, kind: input, shape index: {}]   ;;  %s526_s1 = inlined_call_operand.vmem [shape: bf16[8,16], index: 1, kind: input, shape index: {}]   ;;  %s527_s2 = inlined_call_operand.vmem [shape: f32[8,1], index: 2, kind: input, shape index: {}]   ;;  %s528_s3 = inlined_call_operand.vmem [shape: bf16[2,8,128], index: 3, kind: output, shape index: {}]  }
   0x1   :  { %s490_s14 = smov 0  }
   0x2 LB: > { %s25_s15 = sadd.s32 1, %s457_s13  ;;  %p393_p0 = scmp.ge.s32.totalorder %s461_s14, 1  ;;  %s461_s14 = sphi %s490_s14, %s13_s14   ;;  %s457_s13 = sphi %s488_s13, %s530_s13   ;;  %s453_s12 = sphi %s486_s12, %s529_s12  }
   0x3   : > { %p27_p1 = scmp.ge.s32.totalorder %s25_s15, 2  ;;  %p169_p2 = scmp.lt.s32.totalorder %s461_s14, 3 }
   0x5   : > { %s532_s15 = smov (%p27_p1, %s25_s15), 0  ;;  %p170_p3 = pnand %p393_p0, %p169_p2 }
   0x6   : > { %p203_p4 = scmp.lt.s32.totalorder (!%p170_p3), %s453_s12, 1 }
   0x7   : > { %173 = sbr.rel (%p170_p3) target bundleno = 218 (0xda), region = 32 }
   0xc   : > { %v463_v0 = vmov 0.0   ;;  %vm464_vm0 = vmmov 0   ;;  %v227_v1 = vld [vmem:[%s527_s2] sm:$0xff]  ;;  %s534_s12 = smov (!%p203_p4, %s453_s12), 1  ;;  %v465_v2 = vmov 0   ;;  %vm239_vm1 = vcmask 130048  }
   0xd   : > { %404 = vmatprep.subr.bf16.mxu0 %v463_v0  ;;  %406 = vmatprep.mubr.msk.bf16.mxu0 %vm464_vm0, %v463_v0  ;;  %s401_s18 = sshll.u32 %s534_s12, 3  ;;  %v224_v4 = vld [vmem:[%s526_s1] sm:$0xf]  ;;  %s396_s24 = sshll.u32 %s534_s12, 2 }
   0xe   : > { %437 = vset.pattern.permute.xlu0 %v465_v2  ;;  %s207_s21 = scalar_lea.vmem %s525_s0, %s401_s18  ;;  %s222_s27 = scalar_lea.vmem %s528_s3, %s396_s24 }
   0xf   : > { %230 = vperm.xlu0 %437, %v227_v1   ;;  %v438_v3 = vld [vmem:[%s207_s21] sm:$0xff]  }
  0x10   : > { %405 = vmatpush3.bf16.msra.mxu0 %v438_v3 }
  0x13   : > { %407 = vmatmul.mubr.msk.bf16.vlgmr.msra.gmra.mxu0 %vm239_vm1, %v224_v4 }
  0x8a   : > { %v231_v5 = vpop.permute.xlu0 %230 }
  0xd3   : > { %v277_v6 = vpop.f32.mrf.mxu0 }
  0xd4   : > { %v278_v7 = vadd.f32 %v277_v6, %v231_v5 }
  0xd5   : > { %v408_v8 = vpop.f32.mrf.mxu0 }
  0xd6   : > { %v283_v9 = vpack.c.bf16 %v278_v7, %v278_v7 }
  0xd7   : > { %v280_v10 = vpop.f32.mrf.mxu0 }
  0xd8   : > { %284 = vst [vmem:[%s222_s27] sm:$0xf] %v283_v9 }
  0xd9   : > { %v409_v11 = vpop.f32.mrf.mxu0 }
  0xda PF: > { %s13_s14 = sadd.s32 1, %s461_s14   ;;  %s529_s12 = smov %s457_s13 }
  0xdb   : > { %p10_p5 = scmp.ge.s32.totalorder %s13_s14, 4   ;;  %s530_s13 = smov %s532_s15 }
  0xdd   :  { %12 = sbr.rel (!%p10_p5) target bundleno = 2 (0x2), region = 68 }

// kernel: maniqa_forward.21
= control target key start
LH: loop header
LB: loop body
LE: loop exit
PB: predicated region body
PF: predicated region fallthrough
CT: control target
= control target key end

     0   :  { %s838_s18 = smov 0   ;;  %s964_s0 = inlined_call_operand.vmem [shape: bf16[2,16,128], index: 0, kind: input, shape index: {}]   ;;  %s965_s1 = inlined_call_operand.vmem [shape: bf16[128,256], index: 1, kind: input, shape index: {}]   ;;  %s966_s2 = inlined_call_operand.vmem [shape: f32[1,256], index: 2, kind: input, shape index: {}]   ;;  %s967_s3 = inlined_call_operand.vmem [shape: bf16[256,2], index: 3, kind: input, shape index: {}]   ;;  %s968_s4 = inlined_call_operand.vmem [shape: f32[1,2], index: 4, kind: input, shape index: {}]   ;;  %s969_s5 = inlined_call_operand.vmem [shape: f32[2,1,1], index: 5, kind: output, shape index: {}]  }
   0x1 LB: > { %s665_s19 = sadd.s32 4294967295, %s804_s18   ;;  %p669_p0 = scmp.ge.s32.totalorder %s804_s18, 1  ;;  %s804_s18 = sphi %s838_s18, %s15_s18  }
   0x2   : > { %p187_p1 = scmp.lt.s32.totalorder %s804_s18, 3 }
   0x4   : > { %p188_p2 = pnand %p669_p0, %p187_p1 }
   0x5   : > { %p213_p3 = scmp.lt.s32.totalorder (!%p188_p2), %s665_s19, 1  ;;  %s807_s24 = smov (!%p188_p2), 127  }
   0x6   : > { %191 = sbr.rel (%p188_p2) target bundleno = 827 (0x33b), region = 40 }
   0xb   : > { %v747_v0 = vld [vmem:[%s965_s1 + $0x74] ss:$8 sps:$4 sm:$0xff]   ;;  %v749_v1 = vld [vmem:[%s965_s1 + $0x70] ss:$8 sps:$4 sm:$0xff]   ;;  %v806_v2 = vmov 0   ;;  %s971_s19 = smov (!%p213_p3, %s665_s19), 1  ;;  %v242_v34 = vlaneseq }
   0xc   : > { %370 = vmatprep.mubr.bf16.mxu0 %v806_v2  ;;  %338 = vmatprep.subr.bf16.mxu0 %v747_v0  ;;  %v750_v3 = vld [vmem:[%s965_s1 + $0x64] ss:$8 sps:$4 sm:$0xff]   ;;  %v752_v4 = vld [vmem:[%s965_s1 + $0x60] ss:$8 sps:$4 sm:$0xff]   ;;  %v753_v5 = vld [vmem:[%s965_s1 + $0x54] ss:$8 sps:$4 sm:$0xff]   ;;  %s220_s29 = scalar_lea.vmem %s969_s5, %s971_s19 }
   0xd   : > { %339 = vmatpush1.bf16.msra.mxu0 %v749_v1  ;;  %s710_s30 = sshll.u32 %s971_s19, 3  ;;  %v755_v6 = vld [vmem:[%s965_s1 + $0x50] ss:$8 sps:$4 sm:$0xff]   ;;  %v756_v7 = vld [vmem:[%s965_s1 + $0x44] ss:$8 sps:$4 sm:$0xff]   ;;  %v243_v35 = vshrl.u32 %v242_v34, 7 }
   0xe   : > { %340 = vmatprep.subr.bf16.mxu0 %v750_v3  ;;  %s873_s12 = scalar_lea.vmem %s964_s0, %s710_s30  ;;  %v758_v8 = vld [vmem:[%s965_s1 + $0x40] ss:$8 sps:$4 sm:$0xff]   ;;  %v759_v9 = vld [vmem:[%s965_s1 + $0x34] ss:$8 sps:$4 sm:$0xff]   ;;  %v761_v11 = vld [vmem:[%s965_s1 + $0x30] ss:$8 sps:$4 sm:$0xff]  }
   0xf   : > { %v772_v10 = vld [vmem:[%s967_s3 + $0x78] sm:$0xff]   ;;  %v762_v13 = vld [vmem:[%s965_s1 + $0x24] ss:$8 sps:$4 sm:$0xff]   ;;  %v774_v14 = vld [vmem:[%s967_s3 + $0x70] sm:$0xff]   ;;  %v248_v36 = vsub.s32 1, %v243_v35  ;;  %v244_v37 = vsub.s32 0, %v243_v35 }
  0x10   : > { %v773_v12 = vld [vmem:[%s967_s3 + $0x38] sm:$0xff]   ;;  %711 = vmatprep.subr.bf16.mxu1 %v772_v10  ;;  %v775_v15 = vld [vmem:[%s967_s3 + $0x30] sm:$0xff]   ;;  %v776_v16 = vld [vmem:[%s967_s3 + $0x68] sm:$0xff]   ;;  %vm587_vm0 = vcmask 7168   ;;  %vm616_vm1 = vcmask 0  }
  0x11   : > { %341 = vmatpush1.bf16.msra.mxu0 %v752_v4  ;;  %712 = vmatpush3.bf16.msra.mxu1 %v773_v12  ;;  %v764_v17 = vld [vmem:[%s965_s1 + $0x20] ss:$8 sps:$4 sm:$0xff]   ;;  %v765_v18 = vld [vmem:[%s965_s1 + $0x14] ss:$8 sps:$4 sm:$0xff]   ;;  %v767_v21 = vld [vmem:[%s965_s1 + $0x10] ss:$8 sps:$4 sm:$0xff]  }
  0x12   : > { %342 = vmatprep.subr.bf16.mxu0 %v753_v5  ;;  %713 = vmatprep.subr.bf16.mxu1 %v774_v14  ;;  %v777_v19 = vld [vmem:[%s967_s3 + $0x28] sm:$0xff]   ;;  %v778_v20 = vld [vmem:[%s967_s3 + $0x60] sm:$0xff]   ;;  %v780_v24 = vld [vmem:[%s967_s3 + $0x58] sm:$0xff]  }
  0x13   : > { %v779_v22 = vld [vmem:[%s967_s3 + $0x20] sm:$0xff]   ;;  %v781_v26 = vld [vmem:[%s967_s3 + $0x18] sm:$0xff]   ;;  %v782_v28 = vld [vmem:[%s967_s3 + $0x50] sm:$0xff]  }
  0x14   : > { %v768_v23 = vld [vmem:[%s965_s1 + $0x4] ss:$8 sps:$4 sm:$0xff]   ;;  %v770_v25 = vld [vmem:[%s965_s1] ss:$8 sps:$4 sm:$0xff]   ;;  %v783_v29 = vld [vmem:[%s967_s3 + $0x10] sm:$0xff]  }
  0x15   : > { %343 = vmatpush1.bf16.msra.mxu0 %v755_v6  ;;  %714 = vmatpush3.bf16.msra.mxu1 %v775_v15  ;;  %v771_v27 = vld [vmem:[%s873_s12] sm:$0xff]   ;;  %v784_v30 = vld [vmem:[%s967_s3 + $0x48] sm:$0xff]  }
  0x16   : > { %344 = vmatprep.subr.bf16.mxu0 %v756_v7  ;;  %715 = vmatprep.subr.bf16.mxu1 %v776_v16  ;;  %v785_v31 = vld [vmem:[%s967_s3 + $0x8] sm:$0xff]   ;;  %v786_v32 = vld [vmem:[%s967_s3 + $0x40] sm:$0xff]  }
  0x17   : > { %v787_v33 = vld [vmem:[%s967_s3] sm:$0xff]  }
  0x18   : > { %v240_v38 = vld [vmem:[%s966_s2] sm:$0x3] }
  0x19   : > { %345 = vmatpush1.bf16.msra.mxu0 %v758_v8  ;;  %716 = vmatpush3.bf16.msra.mxu1 %v777_v19  ;;  %v249_v40 = vrot.slane %v240_v38, %v248_v36  ;;  %v245_v41 = vrot.slane %v240_v38, %v244_v37  ;;  %v689_v56 = vld [vmem:[%s968_s4] ss:$0 sm:$0xff] }
  0x1a   : > { %346 = vmatprep.subr.bf16.mxu0 %v759_v9  ;;  %717 = vmatprep.subr.bf16.mxu1 %v778_v20 }
  0x1d   : > { %347 = vmatpush1.bf16.msra.mxu0 %v761_v11  ;;  %718 = vmatpush3.bf16.msra.mxu1 %v779_v22 }
  0x1e   : > { %348 = vmatprep.subr.bf16.mxu0 %v762_v13  ;;  %719 = vmatprep.subr.bf16.mxu1 %v780_v24 }
  0x21   : > { %349 = vmatpush1.bf16.msra.mxu0 %v764_v17  ;;  %720 = vmatpush3.bf16.msra.mxu1 %v781_v26 }
  0x22   : > { %350 = vmatprep.subr.bf16.mxu0 %v765_v18  ;;  %721 = vmatprep.subr.bf16.mxu1 %v782_v28 }
  0x25   : > { %351 = vmatpush1.bf16.msra.mxu0 %v767_v21  ;;  %722 = vmatpush3.bf16.msra.mxu1 %v783_v29 }
  0x26   : > { %352 = vmatprep.subr.bf16.mxu0 %v768_v23  ;;  %723 = vmatprep.subr.bf16.mxu1 %v784_v30 }
  0x29   : > { %353 = vmatpush1.bf16.msra.mxu0 %v770_v25  ;;  %724 = vmatpush3.bf16.msra.mxu1 %v785_v31 }
  0x2a   : > { %725 = vmatprep.subr.bf16.mxu1 %v786_v32 }
  0x2c   : > { %371 = vmatmul.mubr.bf16.vlgmr.msra.gmra.mxu0 %v771_v27 }
  0x2d   : > { %726 = vmatpush3.bf16.msra.mxu1 %v787_v33 }
  0xec   : > { %v372_v39 = vpop.f32.mrf.mxu0 }
  0xed   : > { %v373_v46 = vadd.f32 %v372_v39, %v245_v41 }
  0xee   : > { %v374_v42 = vpop.f32.mrf.mxu0 }
  0xef   : > { %v375_v44 = vadd.f32 %v374_v42, %v249_v40  ;;  %v381_v52 = vmax.f32 %v373_v46, 0.0 }
  0xf0   : > { %v376_v43 = vpop.f32.mrf.mxu0 }
  0xf1   : > { %v377_v45 = vadd.f32 %v376_v43, %v245_v41  ;;  %v382_v50 = vmax.f32 %v375_v44, 0.0 }
  0xf2   : > { %v378_v47 = vpop.f32.mrf.mxu0 }
  0xf3   : > { %v379_v48 = vadd.f32 %v378_v47, %v249_v40  ;;  %v383_v49 = vmax.f32 %v377_v45, 0.0 }
  0xf5   : > { %v384_v51 = vmax.f32 %v379_v48, 0.0  ;;  %v385_v54 = vpack.c.bf16 %v383_v49, %v381_v52 }
  0xf7   : > { %v386_v53 = vpack.c.bf16 %v384_v51, %v382_v50 }
  0xf9   : > { %554 = vmatprep.mubr.bf16.mxu1 %v386_v53 }
  0xfa   : > { %555 = vmatmul.mubr.bf16.vlgmr.msra.gmra.mxu1 %v385_v54 }
 0x1ba   : > { %v727_v55 = vpop.f32.mrf.mxu1 }
 0x1bc   : > { %v728_v57 = vpop.f32.mrf.mxu1 }
 0x1bd   : > { %v729_v58 = vadd.f32 %v728_v57, %v727_v55 }
 0x1be   : > { %v730_v59 = vpop.f32.mrf.mxu1 }
 0x1bf   : > { %v557_v60 = vadd.f32 %v729_v58, %v689_v56 }
 0x1c0   : > { %v731_v61 = vpop.f32.mrf.mxu1 }
 0x1c1   : > { %v706_v62 = vmul.f32 -1.442695, %v557_v60  ;;  %v732_v63 = vadd.f32 %v731_v61, %v730_v59  ;;  %v563_v9 = vmax.f32 %v557_v60, 0.0 }
 0x1c3   : > { %788 = vpow2.f32 %v706_v62  ;;  %v560_v0 = vadd.f32 %v732_v63, %v689_v56 }
 0x1c5   : > { %v707_v1 = vmul.f32 -1.442695, %v560_v0  ;;  %v564_v11 = vmax.f32 %v560_v0, 0.0 }
 0x1c7   : > { %790 = vpow2.f32 %v707_v1 }
 0x1d0   : > { %v789_v2 = vpop.eup %788 }
 0x1d1   : > { %v571_v3 = vadd.f32 1.0, %v789_v2 }
 0x1d3   : > { %792 = vrcp.f32 %v571_v3 }
 0x1d4   : > { %v791_v4 = vpop.eup %790 }
 0x1d5   : > { %v572_v5 = vadd.f32 1.0, %v791_v4 }
 0x1d7   : > { %794 = vrcp.f32 %v572_v5 }
 0x1e0   : > { %v793_v6 = vpop.eup %792 }
 0x1e1   : > { %579 = vrot.lane.b32.xlu0 %v793_v6, %s807_s24 }
 0x1e4   : > { %v795_v7 = vpop.eup %794 }
 0x1e5   : > { %581 = vrot.lane.b32.xlu0 %v795_v7, %s807_s24 }
 0x253   : > { %v580_v8 = vpop.permute.xlu0 %579 }
 0x254   : > { %v585_v10 = vmul.f32 %v580_v8, %v563_v9  ;;  %v601_v18 = vsel %vm587_vm0, %v580_v8, 0.0 }
 0x256   : > { %v588_v14 = vsel %vm587_vm0, %v585_v10, 0.0 }
 0x257   : > { %v582_v12 = vpop.permute.xlu0 %581 }
 0x258   : > { %v586_v13 = vmul.f32 %v582_v12, %v564_v11  ;;  %v602_v17 = vsel %vm587_vm0, %v582_v12, 0.0 }
 0x259   : > { %v603_v19 = vadd.f32 %v602_v17, %v601_v18 }
 0x25a   : > { %v589_v15 = vsel %vm587_vm0, %v586_v13, 0.0 }
 0x25b   : > { %v590_v16 = vadd.f32 %v589_v15, %v588_v14 }
 0x25d   : > { %591 = vadd.xlane.f32.xlu1 %v590_v16 }
 0x261   : > { %604 = vadd.xlane.f32.xlu1 %v603_v19 }
 0x2e6   : > { %v592_v20 = vpop.xlane.xlu1 %591 }
 0x2e7   : > { %v593_v21 = vrot.slane %v592_v20, 4 }
 0x2e9   : > { %v594_v22 = vadd.f32 %v593_v21, %v592_v20 }
 0x2ea   : > { %v605_v23 = vpop.xlane.xlu1 %604 }
 0x2eb   : > { %v595_v24 = vrot.slane %v594_v22, 2  ;;  %v606_v25 = vrot.slane %v605_v23, 4 }
 0x2ed   : > { %v607_v26 = vadd.f32 %v606_v25, %v605_v23  ;;  %v596_v27 = vadd.f32 %v595_v24, %v594_v22 }
 0x2ef   : > { %v608_v28 = vrot.slane %v607_v26, 2  ;;  %v597_v29 = vrot.slane %v596_v27, 1 }
 0x2f1   : > { %v609_v30 = vadd.f32 %v608_v28, %v607_v26  ;;  %v598_v31 = vadd.f32 %v597_v29, %v596_v27 }
 0x2f3   : > { %733 = vpush %v598_v31  ;;  %v610_v32 = vrot.slane %v609_v30, 1 }
 0x2f5   : > { %v611_v33 = vadd.f32 %v610_v32, %v609_v30 }
 0x2f7   : > { %735 = vpush %v611_v33 }
 0x324   : > { %s734_s25 = spop %733 }
 0x325   : > { %v600_v36 = vstv %s734_s25 }
 0x328   : > { %s736_s26 = spop %735 }
 0x329   : > { %v613_v34 = vstv %s736_s26 }
 0x32a   : > { %796 = vrcp.f32 %v613_v34 }
 0x337   : > { %v797_v35 = vpop.eup %796 }
 0x338   : > { %v615_v37 = vmul.f32 %v797_v35, %v600_v36 }
 0x33a   : > { %617 = vst.msk [vmem:[%s220_s29] sm:$0x1] %vm616_vm1, %v615_v37 }
 0x33b PF: > { %s15_s18 = sadd.s32 1, %s804_s18  }
 0x33c   : > { %p12_p4 = scmp.ge.s32.totalorder %s15_s18, 4  }
 0x33e   :  { %14 = sbr.rel (!%p12_p4) target bundleno = 1 (0x1), region = 70 }

</bundles_post_ra>
